<compile_context>
chip_gen: v6e
topology: v6e:2x2x1
jax: 0.10.0
libtpu: 0.0.40
codegen_flags: <defaults>
</compile_context>

<pallas_src>
import functools
import math
from typing import NamedTuple

import jax
import jax.numpy as jnp
from jax.experimental import pallas as pl
from jax.experimental.pallas import tpu as pltpu


def _round_up(x, m):
    return ((x + m - 1) // m) * m


def _vmem_capacity_bytes():
    """Physical VMEM per TensorCore; conservative 64 MiB (v7x) fallback."""
    cap = 64 * 1024 * 1024
    try:
        info = pltpu.get_tpu_info()
        cap = int(getattr(info, "vmem_capacity_bytes", cap) or cap)
    except Exception:
        pass
    return cap


def _tile_vmem_bytes(tm, ti, H, act_sz, w_sz, out_sz, wdepth=2, with_acc=True):
    """VMEM for one grid step.  Buffer depths are counted exactly once."""
    w_bufs = wdepth * (H * 2 * ti + ti * H) * w_sz   # fused gate/up + down tiles
    x_bufs = 2 * tm * H * act_sz                     # x tile (double-buffered)
    o_bufs = 2 * tm * H * out_sz                     # out tile (double-buffered)
    acc = tm * H * 4 if with_acc else 0              # f32 accumulator scratch
    tmp = 4 * tm * ti * 4                            # gu/gate/up/hidden f32 temps
    return w_bufs + x_bufs + o_bufs + acc + tmp


def _choose_ti(H, I, w_sz, budget):
    """Pick the I tile.  >= 256 preferred: at ti=128 the per-k (tm, H)
    accumulator RMW saturates the single vst slot before the MXU, and
    ti >= 256 fills the 256-deep MXU contraction of the down-proj dot on
    v6e/v7x.  ti=512 is only taken when its double-buffered weight tiles stay
    under ~1/3 of the budget (so tm can stay large)."""
    def w_tile(ti):
        return 2 * (H * 2 * ti + ti * H) * w_sz

    if I % 512 == 0 and w_tile(512) <= budget // 3:
        return 512
    for ti in (256, 128):
        if I % ti == 0:
            return ti
    # Odd intermediate sizes: keep the whole I resident (single k step).
    return I


_TM_CANDIDATES = (768, 640, 512, 384, 320, 256, 192, 128, 64, 32, 16, 8)


def _choose_tm(M, H, ti, act_sz, w_sz, out_sz, budget, wdepth=2):
    """Largest row tile that fits the budget (arithmetic intensity == tm)."""
    Mr = _round_up(max(M, 8), 8)
    cands = sorted({min(Mr, t) for t in _TM_CANDIDATES}, reverse=True)
    for tm in cands:
        if _tile_vmem_bytes(tm, ti, H, act_sz, w_sz, out_sz,
                            wdepth=wdepth, with_acc=True) <= budget:
            return tm
    # Nothing fits the (conservative) budget: fall back to the smallest tile;
    # vmem_limit_bytes below is clamped to physical capacity so the compiler
    # has the final word instead of an unchecked over-request.
    return cands[-1]


class LlamaMLPParams(NamedTuple):
    wgu: jax.Array          # (nk, H, 2*ti)  k-major fused [gate_k | up_k] slab
    wd: jax.Array           # (I, H)         down_proj weight (rows contiguous per tile)
    ti: int
    hidden_size: int
    intermediate_size: int


def prepare_llama_mlp_params(wg, wu, wd, *, ti=None):
    """Build the kernel weight layout ONCE at weight-load time (hoisted out of
    the forward path -- avoids a full weight-sized HBM copy per call).

    wg, wu: (H, I) transposed gate/up weights (PyTorch weight.T).
    wd    : (I, H) transposed down weight.
    """
    H, I = wg.shape
    assert wu.shape == (H, I) and wd.shape == (I, H)
    if ti is None:
        ti = _choose_ti(H, I, jnp.dtype(wg.dtype).itemsize,
                        int(0.8 * _vmem_capacity_bytes()))
    assert I % ti == 0, "intermediate size must be divisible by the I tile"
    nk = I // ti
    # k-major fused layout: per I-tile the columns are [gate_k | up_k] and the
    # whole (H, 2*ti) tile is contiguous in HBM -> each weight DMA is a single
    # unstrided stream (no H short strided segments).
    wgu = jnp.concatenate(
        [wg.reshape(H, nk, ti), wu.reshape(H, nk, ti)], axis=-1)   # (H, nk, 2ti)
    wgu = jnp.transpose(wgu, (1, 0, 2))                            # (nk, H, 2ti)
    return LlamaMLPParams(wgu=wgu, wd=wd, ti=ti,
                          hidden_size=H, intermediate_size=I)


def _mlp_acc_kernel(x_ref, wgu_ref, wd_ref, o_ref, acc_ref, *, ti):
    """nk-per-split > 1: down-proj partials accumulate into f32 VMEM scratch.

    x_ref  : (tm, H)        activation tile (same block for all k)
    wgu_ref: (1, H, 2*ti)   k-major fused [gate_k | up_k] weight tile
    wd_ref : (ti, H)        down_proj weight tile
    o_ref  : (1, tm, H)     output tile (written at the last k step)
    acc_ref: (tm, H) f32    VMEM accumulator, resident across the k axis
    """
    k = pl.program_id(2)

    @pl.when(k == 0)
    def _():
        acc_ref[...] = jnp.zeros_like(acc_ref)

    x = x_ref[...]
    # One wide matmul covers both gate and up projections (f32 accumulate).
    gu = jnp.dot(x, wgu_ref[0], preferred_element_type=jnp.float32)
    gate = gu[:, :ti]
    up = gu[:, ti:]
    hidden = (gate * jax.nn.sigmoid(gate)) * up          # silu(gate) * up, f32
    # Cast on the small (tm, ti) tile only, then down-proj partial product.
    acc_ref[...] += jnp.dot(hidden.astype(wd_ref.dtype), wd_ref[...],
                            preferred_element_type=jnp.float32)

    @pl.when(k == pl.num_programs(2) - 1)
    def _():
        o_ref[0] = acc_ref[...].astype(o_ref.dtype)


def _mlp_single_kernel(x_ref, wgu_ref, wd_ref, o_ref, *, ti):
    """nk-per-split == 1: whole (per-split) I resident -> no accumulator RMW,
    no init/finalize, no scratch VMEM."""
    x = x_ref[...]
    gu = jnp.dot(x, wgu_ref[0], preferred_element_type=jnp.float32)
    gate = gu[:, :ti]
    up = gu[:, ti:]
    hidden = (gate * jax.nn.sigmoid(gate)) * up
    o_ref[0] = jnp.dot(hidden.astype(wd_ref.dtype), wd_ref[...],
                       preferred_element_type=jnp.float32).astype(o_ref.dtype)


def llama_mlp(x, params: LlamaMLPParams, *, tm=None, split=None,
              weight_buffer_depth=None):
    """x: (..., H).  params: from prepare_llama_mlp_params (built once)."""
    H = params.hidden_size
    I = params.intermediate_size
    ti = params.ti
    nk = I // ti
    assert x.shape[-1] == H

    orig_shape = x.shape
    x2 = x.reshape(-1, H)
    M = x2.shape[0]

    act_sz = jnp.dtype(x.dtype).itemsize
    w_sz = jnp.dtype(params.wgu.dtype).itemsize
    capacity = _vmem_capacity_bytes()
    budget = int(0.8 * capacity)

    # Decode / small-M reduction split: second "parallel" grid axis over two
    # disjoint halves of I (two partial f32 outputs summed below) so both v7x
    # TensorCores stream disjoint weight halves; ~neutral on single-TC chips.
    if split is None:
        split = 2 if (M <= 64 and nk >= 2 and nk % 2 == 0) else 1
    assert split in (1, 2) and nk % split == 0
    nk_per_s = nk // split
    out_dtype = jnp.float32 if split > 1 else x.dtype
    out_sz = jnp.dtype(out_dtype).itemsize

    # Default pipelining depth (2). Raise to 3 on v5e/v6e only if xprof shows
    # exposed weight DMA at M-tile boundaries (VMEM is plentiful there).
    wdepth = 2 if weight_buffer_depth is None else int(weight_buffer_depth)

    if tm is None:
        tm = _choose_tm(M, H, ti, act_sz, w_sz, out_sz, budget, wdepth=wdepth)
    tm = _round_up(max(tm, 8), 8)

    # Pad rows to a multiple of tm (arbitrary batch*seq; zero rows contribute
    # silu(0)*0 @ Wd == 0, then get sliced off).
    grid_m = pl.cdiv(M, tm)
    Mp = grid_m * tm
    if Mp != M:
        x2 = jnp.pad(x2, ((0, Mp - M), (0, 0)))

    tile_bytes = _tile_vmem_bytes(tm, ti, H, act_sz, w_sz, out_sz,
                                  wdepth=wdepth, with_acc=(nk_per_s > 1))
    # No extra 2x here: tile_bytes already includes buffer depths + temps.
    vmem_limit = int(min(max(tile_bytes + (4 << 20), 32 << 20),
                         int(0.92 * capacity)))

    w_pipe = {} if weight_buffer_depth is None else {
        "pipeline_mode": pl.Buffered(wdepth)}

    if nk_per_s > 1:
        kernel = functools.partial(_mlp_acc_kernel, ti=ti)
        scratch = [pltpu.VMEM((tm, H), jnp.float32)]   # f32 accumulator
    else:
        kernel = functools.partial(_mlp_single_kernel, ti=ti)
        scratch = []

    # TODO(synk): on v7x, reclaim VMEM by single-buffering the k-invariant
    # x/out blocks (pl.Buffered(1)) and spend it on a larger tm; left at the
    # default depth here pending hardware validation.
    out = pl.pallas_call(
        kernel,
        out_shape=jax.ShapeDtypeStruct((split, Mp, H), out_dtype),
        grid_spec=pltpu.PrefetchScalarGridSpec(
            num_scalar_prefetch=0,
            grid=(split, grid_m, nk_per_s),            # reduction axis last
            in_specs=[
                pl.BlockSpec((tm, H), lambda c, i, k: (i, 0)),          # x
                pl.BlockSpec((1, H, 2 * ti),
                             lambda c, i, k: (c * nk_per_s + k, 0, 0),
                             **w_pipe),                                  # [gate|up]
                pl.BlockSpec((ti, H),
                             lambda c, i, k: (c * nk_per_s + k, 0),
                             **w_pipe),                                  # down
            ],
            out_specs=pl.BlockSpec((1, tm, H), lambda c, i, k: (c, i, 0)),
            scratch_shapes=scratch,
        ),
        compiler_params=pltpu.CompilerParams(
            # split / M axes are independent (megacore-shardable on v7x);
            # the I axis carries the accumulator, so it must be "arbitrary".
            dimension_semantics=("parallel", "parallel", "arbitrary"),
            vmem_limit_bytes=vmem_limit,
        ),
    )(x2, params.wgu, params.wd)

    if split > 1:
        out = out.sum(axis=0).astype(x.dtype)   # tiny epilogue (decode-only path)
    else:
        out = out[0]
    if Mp != M:
        out = out[:M]
    return out.reshape(orig_shape)


def llama_mlp_ref(x, wg, wu, wd):
    """Pure-JAX reference (matches PyTorch LlamaMLP with silu act)."""
    gate = x @ wg
    up = x @ wu
    return ((gate * jax.nn.sigmoid(gate)) * up) @ wd


if __name__ == "__main__":
    # Small, TPU-friendly config (config.hidden_act == "silu").
    batch, seq = 2, 7              # M = 14 -> exercises cdiv + zero padding
    hidden_size = 256
    intermediate_size = 512

    key = jax.random.PRNGKey(0)
    kx, kg, ku, kd = jax.random.split(key, 4)

    x = jax.random.normal(kx, (batch, seq, hidden_size), dtype=jnp.float32)

    # PyTorch nn.Linear weights are (out_features, in_features); transpose once.
    gate_w = jax.random.normal(kg, (intermediate_size, hidden_size),
                               dtype=jnp.float32) / math.sqrt(hidden_size)
    up_w = jax.random.normal(ku, (intermediate_size, hidden_size),
                             dtype=jnp.float32) / math.sqrt(hidden_size)
    down_w = jax.random.normal(kd, (hidden_size, intermediate_size),
                               dtype=jnp.float32) / math.sqrt(intermediate_size)

    wg = gate_w.T   # (H, I)
    wu = up_w.T     # (H, I)
    wd = down_w.T   # (I, H)

    ref = llama_mlp_ref(x.reshape(-1, hidden_size), wg, wu, wd).reshape(x.shape)

    # 1) f32, auto ti (whole I resident -> single-k kernel, no accumulator).
    params = prepare_llama_mlp_params(wg, wu, wd)
    out_f32 = jax.block_until_ready(llama_mlp(x, params))
    assert out_f32.shape == x.shape
    assert jnp.allclose(out_f32, ref, atol=1e-4, rtol=1e-4), "f32 mismatch"

    # 2) forced ti=128 -> several k steps -> accumulator init/finalize path
    #    over the k-major fused weight slab.
    params128 = prepare_llama_mlp_params(wg, wu, wd, ti=128)
    out_tiled = jax.block_until_ready(llama_mlp(x, params128, split=1))
    assert jnp.allclose(out_tiled, ref, atol=1e-4, rtol=1e-4), "tiled mismatch"

    # 3) decode-style reduction split: two partial f32 outputs + epilogue sum
    #    (both TensorCores participate on v7x).
    out_split = jax.block_until_ready(llama_mlp(x, params128, split=2))
    assert jnp.allclose(out_split, ref, atol=1e-4, rtol=1e-4), "split mismatch"

    # 4) bf16 operands (production path: bf16 MXU rate, f32 accumulation),
    #    auto split (M=14 -> dual partial path).
    xb = x.astype(jnp.bfloat16)
    wgb, wub, wdb = (a.astype(jnp.bfloat16) for a in (wg, wu, wd))
    ref_b = llama_mlp_ref(
        xb.astype(jnp.float32).reshape(-1, hidden_size),
        wgb.astype(jnp.float32), wub.astype(jnp.float32),
        wdb.astype(jnp.float32)).reshape(x.shape)
    params_b = prepare_llama_mlp_params(wgb, wub, wdb, ti=128)
    out_bf16 = jax.block_until_ready(llama_mlp(xb, params_b))
    assert jnp.allclose(out_bf16.astype(jnp.float32), ref_b,
                        atol=3e-2, rtol=3e-2), "bf16 mismatch"

    print("KERNEL_OK")
</pallas_src>

<mosaic_0001>
module attributes {stable_mosaic.version = 11 : i64} {
  func.func @_mlp_single_kernel(%arg0: i32, %arg1: i32, %arg2: i32, %arg3: memref<16x256xf32, #tpu.memory_space<vmem>>, %arg4: memref<1x256x1024xf32, #tpu.memory_space<vmem>>, %arg5: memref<512x256xf32, #tpu.memory_space<vmem>>, %arg6: memref<1x16x256xf32, #tpu.memory_space<vmem>>) attributes {dimension_semantics = [#tpu.dimension_semantics<parallel>, #tpu.dimension_semantics<parallel>, #tpu.dimension_semantics<arbitrary>], iteration_bounds = array<i64: 1, 1, 1>, scalar_prefetch = 0 : i64, scratch_operands = 0 : i64, tpu.core_type = #tpu.core_type<tc>, window_params = [{transform_indices = @transform_0, window_bounds = array<i64: 16, 256>}, {transform_indices = @transform_1, window_bounds = array<i64: 1, 256, 1024>}, {transform_indices = @transform_2, window_bounds = array<i64: 512, 256>}, {transform_indices = @transform_3, window_bounds = array<i64: 1, 16, 256>}]} {
    %c0 = arith.constant 0 : index
    %c0_0 = arith.constant 0 : index
    %0 = vector.load %arg3[%c0, %c0_0] : memref<16x256xf32, #tpu.memory_space<vmem>>, vector<16x256xf32>
    %c0_1 = arith.constant 0 : index
    %c0_2 = arith.constant 0 : index
    %c0_3 = arith.constant 0 : index
    %1 = vector.load %arg4[%c0_1, %c0_2, %c0_3] : memref<1x256x1024xf32, #tpu.memory_space<vmem>>, vector<1x256x1024xf32>
    %2 = vector.shape_cast %1 : vector<1x256x1024xf32> to vector<256x1024xf32>
    %cst = arith.constant dense<0.000000e+00> : vector<16x1024xf32>
    %3 = tpu.matmul %0, %2, %cst {dimension_numbers = #tpu.dot_dimension_numbers<[1], [0], [0], [1], [0, 0, 1, 1], [], []>} : vector<16x256xf32>, vector<256x1024xf32>, vector<16x1024xf32> -> vector<16x1024xf32>
    %4 = vector.extract_strided_slice %3 {offsets = [0, 0], sizes = [16, 512], strides = [1, 1]} : vector<16x1024xf32> to vector<16x512xf32>
    %5 = vector.extract_strided_slice %3 {offsets = [0, 512], sizes = [16, 512], strides = [1, 1]} : vector<16x1024xf32> to vector<16x512xf32>
    %6 = arith.negf %4 : vector<16x512xf32>
    %7 = math.exp %6 : vector<16x512xf32>
    %cst_4 = arith.constant 1.000000e+00 : f32
    %8 = vector.broadcast %cst_4 : f32 to vector<16x512xf32>
    %9 = arith.addf %8, %7 : vector<16x512xf32>
    %10 = arith.divf %8, %9 : vector<16x512xf32>
    %11 = arith.mulf %4, %10 : vector<16x512xf32>
    %12 = arith.mulf %11, %5 : vector<16x512xf32>
    %c0_5 = arith.constant 0 : index
    %c0_6 = arith.constant 0 : index
    %13 = vector.load %arg5[%c0_5, %c0_6] : memref<512x256xf32, #tpu.memory_space<vmem>>, vector<512x256xf32>
    %cst_7 = arith.constant dense<0.000000e+00> : vector<16x256xf32>
    %14 = tpu.matmul %12, %13, %cst_7 {dimension_numbers = #tpu.dot_dimension_numbers<[1], [0], [0], [1], [0, 0, 1, 1], [], []>} : vector<16x512xf32>, vector<512x256xf32>, vector<16x256xf32> -> vector<16x256xf32>
    %c0_8 = arith.constant 0 : index
    %c0_9 = arith.constant 0 : index
    %c0_10 = arith.constant 0 : index
    %15 = vector.load %arg6[%c0_8, %c0_9, %c0_10] : memref<1x16x256xf32, #tpu.memory_space<vmem>>, vector<1x16x256xf32>
    %16 = vector.shape_cast %15 : vector<1x16x256xf32> to vector<16x256xf32>
    %17 = vector.shape_cast %14 : vector<16x256xf32> to vector<1x16x256xf32>
    tpu.vector_store %arg6[%c0_8, %c0_9, %c0_10], %17 {strides = array<i32>} : memref<1x16x256xf32, #tpu.memory_space<vmem>>, vector<1x16x256xf32>,
    return
  }
  func.func @transform_0(%arg0: i32, %arg1: i32, %arg2: i32) -> (i32, i32) {
    %c0_i32 = arith.constant 0 : i32
    %c0_i32_0 = arith.constant 0 : i32
    return %arg1, %c0_i32 : i32, i32
  }
  func.func @transform_1(%arg0: i32, %arg1: i32, %arg2: i32) -> (i32, i32, i32) {
    %c1_i32 = arith.constant 1 : i32
    %0 = arith.muli %arg0, %c1_i32 : i32
    %1 = arith.addi %0, %arg2 : i32
    %c0_i32 = arith.constant 0 : i32
    %c0_i32_0 = arith.constant 0 : i32
    %c0_i32_1 = arith.constant 0 : i32
    return %1, %c0_i32, %c0_i32_0 : i32, i32, i32
  }
  func.func @transform_2(%arg0: i32, %arg1: i32, %arg2: i32) -> (i32, i32) {
    %c1_i32 = arith.constant 1 : i32
    %0 = arith.muli %arg0, %c1_i32 : i32
    %1 = arith.addi %0, %arg2 : i32
    %c0_i32 = arith.constant 0 : i32
    %c0_i32_0 = arith.constant 0 : i32
    return %1, %c0_i32 : i32, i32
  }
  func.func @transform_3(%arg0: i32, %arg1: i32, %arg2: i32) -> (i32, i32, i32) {
    %c0_i32 = arith.constant 0 : i32
    %c0_i32_0 = arith.constant 0 : i32
    return %arg0, %arg1, %c0_i32 : i32, i32, i32
  }
}

</mosaic_0001>

<bundles_post_ra>
// kernel: tpu_custom_call.1
= control target key start
LH: loop header
LB: loop body
LE: loop exit
PB: predicated region body
PF: predicated region fallthrough
CT: control target
= control target key end

     0   :  { %8 = vsyncpa [#allocation3], 0  ;;  %s1219_s0 = inlined_call_operand.hbm [shape: f32[16,256], index: 0, kind: input, shape index: {}]   ;;  %s1220_s1 = inlined_call_operand.hbm [shape: f32[1,256,1024], index: 1, kind: input, shape index: {}]   ;;  %s1221_s2 = inlined_call_operand.hbm [shape: f32[512,256], index: 2, kind: input, shape index: {}]   ;;  %s1222_s3 = inlined_call_operand.hbm [shape: f32[1,16,256], index: 3, kind: output, shape index: {}]  }
   0x1   :  { %9 = vsyncpa [#allocation6], 0 }
   0x2   :  { %10 = vsyncpa [#allocation4], 0  ;;  %s1138_s12 = smov [#allocation5]  }
   0x3   :  { %s32_s13 = sshll.u32 %s1138_s12, 4  ;;  %s33_s13 = int_to_ptr.vmem [resolvable:$true] %s32_s13 }
   0x4   :  { %s1060_s14 = scalar_lea.vmem %s33_s13, 32768  ;;  %p1065_p1 = scmp.lt.s32.totalorder %s33_s13, %s33_s13 }
   0x5   :  { %p1061_p0 = scmp.ne.s32.totalorder %s33_s13, %s1060_s14  ;;  %p1066_p2 = scmp.lt.s32.totalorder %s1060_s14, %s1060_s14 }
   0x7   :  { %p1067_p3 = por %p1066_p2, %p1065_p1 }
   0x9   :  { %p1068_p4 = pnand %p1067_p3, %p1061_p0 }
   0xb   :  { %1071 = shalt.err (!%p1068_p4)
}
   0xc   :  { %s1139_s15 = smov 1024   ;;  %s1140_s16 = smov 64  }
   0xd   :  { %38 = dma.hbm_to_vmem [thread:$0]  %s1220_s1, 32768, %s33_s13, [#allocation6], %s1139_s15, %s1139_s15, %s1140_s16  }
   0xe   :  { %s1141_s19 = smov [#allocation2]  }
   0xf   :  { %s16_s20 = sshll.u32 %s1141_s19, 4  ;;  %s17_s20 = int_to_ptr.vmem [resolvable:$true] %s16_s20 }
  0x10   :  { %s1080_s21 = scalar_lea.vmem %s17_s20, 512  ;;  %p1085_p6 = scmp.lt.s32.totalorder %s17_s20, %s17_s20 }
  0x11   :  { %p1081_p5 = scmp.ne.s32.totalorder %s17_s20, %s1080_s21  ;;  %p1086_p7 = scmp.lt.s32.totalorder %s1080_s21, %s1080_s21 }
  0x13   :  { %p1087_p8 = por %p1086_p7, %p1085_p6 }
  0x15   :  { %p1088_p9 = pnand %p1087_p8, %p1081_p5 }
  0x17   :  { %1091 = shalt.err (!%p1088_p9)
}
  0x18   :  { %s1142_s22 = smov 256   ;;  %s1143_s23 = smov 16  }
  0x19   :  { %22 = dma.hbm_to_vmem [thread:$0]  %s1219_s0, 512, %s17_s20, [#allocation3], %s1142_s22, %s1142_s22, %s1143_s23  }
  0x1a   :  { %s1144_s1 = smov [#allocation7]  }
  0x1b   :  { %s49_s26 = sshll.u32 %s1144_s1, 4  ;;  %s50_s26 = int_to_ptr.vmem [resolvable:$true] %s49_s26 }
  0x1c   :  { %s1100_s27 = scalar_lea.vmem %s50_s26, 16384  ;;  %p1105_p11 = scmp.lt.s32.totalorder %s50_s26, %s50_s26 }
  0x1d   :  { %p1101_p10 = scmp.ne.s32.totalorder %s50_s26, %s1100_s27  ;;  %p1106_p12 = scmp.lt.s32.totalorder %s1100_s27, %s1100_s27 }
  0x1f   :  { %p1107_p13 = por %p1106_p12, %p1105_p11 }
  0x21   :  { %p1108_p0 = pnand %p1107_p13, %p1101_p10 }
  0x23   :  { %1111 = shalt.err (!%p1108_p0)
}
  0x24   :  { %55 = dma.hbm_to_vmem [thread:$0]  %s1221_s2, 16384, %s50_s26, [#allocation6], %s1142_s22, %s1142_s22, %s1143_s23  }
  0x25   :  { %1132 = dma.done.wait [#allocation3], 512  }
  0x26   :  { %1133 = vsyncadd [#allocation3], 4294966784 }
  0x27   :  { %1134 = dma.done.wait [#allocation6], 49152  }
  0x28   :  { %1135 = vsyncadd [#allocation6], 4294918144  ;;  %v193_v0 = vld [vmem:[#allocation5 + $0x3c8] sm:$0xff]  ;;  %v195_v1 = vld [vmem:[#allocation5 + $0x3d8] sm:$0xff]  ;;  %s1145_s0 = smov [#allocation8]  }
  0x29   :  { %v192_v2 = vld [vmem:[#allocation5 + $0x3c0] sm:$0xff]  ;;  %328 = vmatprep.subr.mxu0 %v193_v0  ;;  %405 = vmatprep.subr.mxu1 %v195_v1  ;;  %v194_v3 = vld [vmem:[#allocation5 + $0x3d0] sm:$0xff]  ;;  %v185_v4 = vld [vmem:[#allocation5 + $0x388] sm:$0xff]  ;;  %s991_s2 = sshll.u32 %s1145_s0, 4  ;;  %s992_s2 = int_to_ptr.vmem [resolvable:$true] %s991_s2 }
  0x2a   :  { %v187_v5 = vld [vmem:[#allocation5 + $0x398] sm:$0xff]  ;;  %329 = vmatpush1.msra.mxu0 %v192_v2  ;;  %406 = vmatpush1.msra.mxu1 %v194_v3  ;;  %v184_v6 = vld [vmem:[#allocation5 + $0x380] sm:$0xff]  ;;  %v186_v7 = vld [vmem:[#allocation5 + $0x390] sm:$0xff]  ;;  %s1112_s30 = scalar_lea.vmem %s992_s2, 512  ;;  %p1117_p2 = scmp.lt.s32.totalorder %s992_s2, %s992_s2 }
  0x2b   :  { %v177_v8 = vld [vmem:[#allocation5 + $0x348] sm:$0xff]  ;;  %330 = vmatprep.subr.mxu0 %v185_v4  ;;  %407 = vmatprep.subr.mxu1 %v187_v5  ;;  %v179_v9 = vld [vmem:[#allocation5 + $0x358] sm:$0xff]  ;;  %v176_v10 = vld [vmem:[#allocation5 + $0x340] sm:$0xff]  ;;  %p1113_p1 = scmp.ne.s32.totalorder %s992_s2, %s1112_s30  ;;  %p1118_p3 = scmp.lt.s32.totalorder %s1112_s30, %s1112_s30 }
  0x2c   :  { %v178_v11 = vld [vmem:[#allocation5 + $0x350] sm:$0xff]  ;;  %331 = vmatpush1.msra.mxu0 %v184_v6  ;;  %408 = vmatpush1.msra.mxu1 %v186_v7  ;;  %v169_v12 = vld [vmem:[#allocation5 + $0x308] sm:$0xff]  ;;  %v171_v13 = vld [vmem:[#allocation5 + $0x318] sm:$0xff] }
  0x2d   :  { %332 = vmatprep.subr.mxu0 %v177_v8  ;;  %409 = vmatprep.subr.mxu1 %v179_v9  ;;  %v168_v14 = vld [vmem:[#allocation5 + $0x300] sm:$0xff]  ;;  %v170_v15 = vld [vmem:[#allocation5 + $0x310] sm:$0xff]  ;;  %v161_v16 = vld [vmem:[#allocation5 + $0x2c8] sm:$0xff]  ;;  %p1119_p4 = por %p1118_p3, %p1117_p2 }
  0x2e   :  { %333 = vmatpush1.msra.mxu0 %v176_v10  ;;  %410 = vmatpush1.msra.mxu1 %v178_v11  ;;  %v163_v17 = vld [vmem:[#allocation5 + $0x2d8] sm:$0xff]  ;;  %v160_v18 = vld [vmem:[#allocation5 + $0x2c0] sm:$0xff]  ;;  %v162_v19 = vld [vmem:[#allocation5 + $0x2d0] sm:$0xff] }
  0x2f   :  { %334 = vmatprep.subr.mxu0 %v169_v12  ;;  %411 = vmatprep.subr.mxu1 %v171_v13  ;;  %v153_v20 = vld [vmem:[#allocation5 + $0x288] sm:$0xff]  ;;  %v155_v21 = vld [vmem:[#allocation5 + $0x298] sm:$0xff]  ;;  %v152_v22 = vld [vmem:[#allocation5 + $0x280] sm:$0xff]  ;;  %p1120_p5 = pnand %p1119_p4, %p1113_p1 }
  0x30   :  { %335 = vmatpush1.msra.mxu0 %v168_v14  ;;  %412 = vmatpush1.msra.mxu1 %v170_v15  ;;  %v154_v23 = vld [vmem:[#allocation5 + $0x290] sm:$0xff]  ;;  %v145_v24 = vld [vmem:[#allocation5 + $0x248] sm:$0xff]  ;;  %v147_v25 = vld [vmem:[#allocation5 + $0x258] sm:$0xff] }
  0x31   :  { %336 = vmatprep.subr.mxu0 %v161_v16  ;;  %413 = vmatprep.subr.mxu1 %v163_v17  ;;  %v144_v26 = vld [vmem:[#allocation5 + $0x240] sm:$0xff]  ;;  %v146_v27 = vld [vmem:[#allocation5 + $0x250] sm:$0xff]  ;;  %v137_v28 = vld [vmem:[#allocation5 + $0x208] sm:$0xff] }
  0x32   :  { %337 = vmatpush1.msra.mxu0 %v160_v18  ;;  %414 = vmatpush1.msra.mxu1 %v162_v19  ;;  %v139_v29 = vld [vmem:[#allocation5 + $0x218] sm:$0xff]  ;;  %v136_v30 = vld [vmem:[#allocation5 + $0x200] sm:$0xff]  ;;  %v138_v31 = vld [vmem:[#allocation5 + $0x210] sm:$0xff] }
  0x33   :  { %338 = vmatprep.subr.mxu0 %v153_v20  ;;  %415 = vmatprep.subr.mxu1 %v155_v21  ;;  %v129_v32 = vld [vmem:[#allocation5 + $0x1c8] sm:$0xff]  ;;  %v131_v33 = vld [vmem:[#allocation5 + $0x1d8] sm:$0xff]  ;;  %v128_v34 = vld [vmem:[#allocation5 + $0x1c0] sm:$0xff] }
  0x34   :  { %339 = vmatpush1.msra.mxu0 %v152_v22  ;;  %416 = vmatpush1.msra.mxu1 %v154_v23  ;;  %v130_v35 = vld [vmem:[#allocation5 + $0x1d0] sm:$0xff]  ;;  %v121_v36 = vld [vmem:[#allocation5 + $0x188] sm:$0xff]  ;;  %v123_v37 = vld [vmem:[#allocation5 + $0x198] sm:$0xff] }
  0x35   :  { %340 = vmatprep.subr.mxu0 %v145_v24  ;;  %417 = vmatprep.subr.mxu1 %v147_v25  ;;  %v120_v38 = vld [vmem:[#allocation5 + $0x180] sm:$0xff]  ;;  %v122_v39 = vld [vmem:[#allocation5 + $0x190] sm:$0xff]  ;;  %v113_v40 = vld [vmem:[#allocation5 + $0x148] sm:$0xff] }
  0x36   :  { %341 = vmatpush1.msra.mxu0 %v144_v26  ;;  %418 = vmatpush1.msra.mxu1 %v146_v27  ;;  %v115_v41 = vld [vmem:[#allocation5 + $0x158] sm:$0xff]  ;;  %v112_v42 = vld [vmem:[#allocation5 + $0x140] sm:$0xff]  ;;  %v114_v43 = vld [vmem:[#allocation5 + $0x150] sm:$0xff] }
  0x37   :  { %342 = vmatprep.subr.mxu0 %v137_v28  ;;  %419 = vmatprep.subr.mxu1 %v139_v29  ;;  %v105_v44 = vld [vmem:[#allocation5 + $0x108] sm:$0xff]  ;;  %v107_v45 = vld [vmem:[#allocation5 + $0x118] sm:$0xff]  ;;  %v104_v46 = vld [vmem:[#allocation5 + $0x100] sm:$0xff] }
  0x38   :  { %343 = vmatpush1.msra.mxu0 %v136_v30  ;;  %420 = vmatpush1.msra.mxu1 %v138_v31  ;;  %v106_v47 = vld [vmem:[#allocation5 + $0x110] sm:$0xff]  ;;  %v97_v48 = vld [vmem:[#allocation5 + $0xc8] sm:$0xff]  ;;  %v99_v49 = vld [vmem:[#allocation5 + $0xd8] sm:$0xff] }
  0x39   :  { %344 = vmatprep.subr.mxu0 %v129_v32  ;;  %421 = vmatprep.subr.mxu1 %v131_v33  ;;  %v96_v50 = vld [vmem:[#allocation5 + $0xc0] sm:$0xff]  ;;  %v98_v51 = vld [vmem:[#allocation5 + $0xd0] sm:$0xff]  ;;  %v89_v52 = vld [vmem:[#allocation5 + $0x88] sm:$0xff] }
  0x3a   :  { %345 = vmatpush1.msra.mxu0 %v128_v34  ;;  %422 = vmatpush1.msra.mxu1 %v130_v35  ;;  %v91_v53 = vld [vmem:[#allocation5 + $0x98] sm:$0xff]  ;;  %v88_v54 = vld [vmem:[#allocation5 + $0x80] sm:$0xff]  ;;  %v90_v55 = vld [vmem:[#allocation5 + $0x90] sm:$0xff] }
  0x3b   :  { %346 = vmatprep.subr.mxu0 %v121_v36  ;;  %423 = vmatprep.subr.mxu1 %v123_v37  ;;  %v81_v56 = vld [vmem:[#allocation5 + $0x48] sm:$0xff]  ;;  %v83_v57 = vld [vmem:[#allocation5 + $0x58] sm:$0xff]  ;;  %v80_v58 = vld [vmem:[#allocation5 + $0x40] sm:$0xff] }
  0x3c   :  { %347 = vmatpush1.msra.mxu0 %v120_v38  ;;  %424 = vmatpush1.msra.mxu1 %v122_v39  ;;  %v82_v59 = vld [vmem:[#allocation5 + $0x50] sm:$0xff]  ;;  %v73_v60 = vld [vmem:[#allocation5 + $0x8] sm:$0xff]  ;;  %v75_v61 = vld [vmem:[#allocation5 + $0x18] sm:$0xff] }
  0x3d   :  { %348 = vmatprep.subr.mxu0 %v113_v40  ;;  %425 = vmatprep.subr.mxu1 %v115_v41  ;;  %v72_v62 = vld [vmem:[#allocation5] sm:$0xff]  ;;  %v74_v63 = vld [vmem:[#allocation5 + $0x10] sm:$0xff]  ;;  %v321_v0 = vld [vmem:[#allocation5 + $0x7c8] sm:$0xff] }
  0x3e   :  { %349 = vmatpush1.msra.mxu0 %v112_v42  ;;  %426 = vmatpush1.msra.mxu1 %v114_v43  ;;  %v323_v1 = vld [vmem:[#allocation5 + $0x7d8] sm:$0xff]  ;;  %v320_v2 = vld [vmem:[#allocation5 + $0x7c0] sm:$0xff]  ;;  %v322_v3 = vld [vmem:[#allocation5 + $0x7d0] sm:$0xff] }
  0x3f   :  { %350 = vmatprep.subr.mxu0 %v105_v44  ;;  %427 = vmatprep.subr.mxu1 %v107_v45  ;;  %v313_v4 = vld [vmem:[#allocation5 + $0x788] sm:$0xff]  ;;  %v315_v5 = vld [vmem:[#allocation5 + $0x798] sm:$0xff]  ;;  %v312_v6 = vld [vmem:[#allocation5 + $0x780] sm:$0xff] }
  0x40   :  { %351 = vmatpush1.msra.mxu0 %v104_v46  ;;  %428 = vmatpush1.msra.mxu1 %v106_v47  ;;  %v314_v7 = vld [vmem:[#allocation5 + $0x790] sm:$0xff]  ;;  %v305_v8 = vld [vmem:[#allocation5 + $0x748] sm:$0xff]  ;;  %v307_v9 = vld [vmem:[#allocation5 + $0x758] sm:$0xff] }
  0x41   :  { %352 = vmatprep.subr.mxu0 %v97_v48  ;;  %429 = vmatprep.subr.mxu1 %v99_v49  ;;  %v304_v10 = vld [vmem:[#allocation5 + $0x740] sm:$0xff]  ;;  %v306_v11 = vld [vmem:[#allocation5 + $0x750] sm:$0xff]  ;;  %v297_v12 = vld [vmem:[#allocation5 + $0x708] sm:$0xff] }
  0x42   :  { %353 = vmatpush1.msra.mxu0 %v96_v50  ;;  %430 = vmatpush1.msra.mxu1 %v98_v51  ;;  %v299_v13 = vld [vmem:[#allocation5 + $0x718] sm:$0xff]  ;;  %v296_v14 = vld [vmem:[#allocation5 + $0x700] sm:$0xff]  ;;  %v298_v15 = vld [vmem:[#allocation5 + $0x710] sm:$0xff] }
  0x43   :  { %354 = vmatprep.subr.mxu0 %v89_v52  ;;  %431 = vmatprep.subr.mxu1 %v91_v53  ;;  %v289_v16 = vld [vmem:[#allocation5 + $0x6c8] sm:$0xff]  ;;  %v291_v17 = vld [vmem:[#allocation5 + $0x6d8] sm:$0xff]  ;;  %v288_v18 = vld [vmem:[#allocation5 + $0x6c0] sm:$0xff] }
  0x44   :  { %355 = vmatpush1.msra.mxu0 %v88_v54  ;;  %432 = vmatpush1.msra.mxu1 %v90_v55  ;;  %v290_v19 = vld [vmem:[#allocation5 + $0x6d0] sm:$0xff]  ;;  %v281_v20 = vld [vmem:[#allocation5 + $0x688] sm:$0xff]  ;;  %v283_v21 = vld [vmem:[#allocation5 + $0x698] sm:$0xff] }
  0x45   :  { %356 = vmatprep.subr.mxu0 %v81_v56  ;;  %433 = vmatprep.subr.mxu1 %v83_v57  ;;  %v280_v22 = vld [vmem:[#allocation5 + $0x680] sm:$0xff]  ;;  %v282_v23 = vld [vmem:[#allocation5 + $0x690] sm:$0xff]  ;;  %v273_v24 = vld [vmem:[#allocation5 + $0x648] sm:$0xff] }
  0x46   :  { %357 = vmatpush1.msra.mxu0 %v80_v58  ;;  %434 = vmatpush1.msra.mxu1 %v82_v59  ;;  %v275_v25 = vld [vmem:[#allocation5 + $0x658] sm:$0xff]  ;;  %v272_v26 = vld [vmem:[#allocation5 + $0x640] sm:$0xff]  ;;  %v274_v27 = vld [vmem:[#allocation5 + $0x650] sm:$0xff] }
  0x47   :  { %358 = vmatprep.subr.mxu0 %v73_v60  ;;  %435 = vmatprep.subr.mxu1 %v75_v61  ;;  %v265_v28 = vld [vmem:[#allocation5 + $0x608] sm:$0xff]  ;;  %v267_v29 = vld [vmem:[#allocation5 + $0x618] sm:$0xff]  ;;  %v264_v30 = vld [vmem:[#allocation5 + $0x600] sm:$0xff] }
  0x48   :  { %359 = vmatpush1.msra.mxu0 %v72_v62  ;;  %436 = vmatpush1.msra.mxu1 %v74_v63  ;;  %v266_v31 = vld [vmem:[#allocation5 + $0x610] sm:$0xff]  ;;  %v257_v32 = vld [vmem:[#allocation5 + $0x5c8] sm:$0xff]  ;;  %v259_v33 = vld [vmem:[#allocation5 + $0x5d8] sm:$0xff] }
  0x49   :  { %360 = vmatprep.subr.mxu0 %v321_v0  ;;  %437 = vmatprep.subr.mxu1 %v323_v1  ;;  %v256_v34 = vld [vmem:[#allocation5 + $0x5c0] sm:$0xff]  ;;  %v258_v35 = vld [vmem:[#allocation5 + $0x5d0] sm:$0xff]  ;;  %v249_v36 = vld [vmem:[#allocation5 + $0x588] sm:$0xff] }
  0x4a   :  { %361 = vmatpush2.msra.mxu0 %v320_v2  ;;  %438 = vmatpush2.msra.mxu1 %v322_v3  ;;  %v251_v37 = vld [vmem:[#allocation5 + $0x598] sm:$0xff]  ;;  %v248_v38 = vld [vmem:[#allocation5 + $0x580] sm:$0xff]  ;;  %v250_v39 = vld [vmem:[#allocation5 + $0x590] sm:$0xff] }
  0x4b   :  { %362 = vmatprep.subr.mxu0 %v313_v4  ;;  %439 = vmatprep.subr.mxu1 %v315_v5  ;;  %v241_v40 = vld [vmem:[#allocation5 + $0x548] sm:$0xff]  ;;  %v243_v41 = vld [vmem:[#allocation5 + $0x558] sm:$0xff]  ;;  %v240_v42 = vld [vmem:[#allocation5 + $0x540] sm:$0xff] }
  0x4c   :  { %363 = vmatpush2.msra.mxu0 %v312_v6  ;;  %440 = vmatpush2.msra.mxu1 %v314_v7  ;;  %v242_v43 = vld [vmem:[#allocation5 + $0x550] sm:$0xff]  ;;  %v233_v44 = vld [vmem:[#allocation5 + $0x508] sm:$0xff]  ;;  %v235_v45 = vld [vmem:[#allocation5 + $0x518] sm:$0xff] }
  0x4d   :  { %364 = vmatprep.subr.mxu0 %v305_v8  ;;  %441 = vmatprep.subr.mxu1 %v307_v9  ;;  %v232_v46 = vld [vmem:[#allocation5 + $0x500] sm:$0xff]  ;;  %v234_v47 = vld [vmem:[#allocation5 + $0x510] sm:$0xff]  ;;  %v225_v48 = vld [vmem:[#allocation5 + $0x4c8] sm:$0xff] }
  0x4e   :  { %365 = vmatpush2.msra.mxu0 %v304_v10  ;;  %442 = vmatpush2.msra.mxu1 %v306_v11  ;;  %v227_v49 = vld [vmem:[#allocation5 + $0x4d8] sm:$0xff]  ;;  %v224_v50 = vld [vmem:[#allocation5 + $0x4c0] sm:$0xff]  ;;  %v226_v51 = vld [vmem:[#allocation5 + $0x4d0] sm:$0xff] }
  0x4f   :  { %366 = vmatprep.subr.mxu0 %v297_v12  ;;  %443 = vmatprep.subr.mxu1 %v299_v13  ;;  %v217_v52 = vld [vmem:[#allocation5 + $0x488] sm:$0xff]  ;;  %v219_v53 = vld [vmem:[#allocation5 + $0x498] sm:$0xff]  ;;  %v216_v54 = vld [vmem:[#allocation5 + $0x480] sm:$0xff] }
  0x50   :  { %367 = vmatpush2.msra.mxu0 %v296_v14  ;;  %444 = vmatpush2.msra.mxu1 %v298_v15  ;;  %v218_v55 = vld [vmem:[#allocation5 + $0x490] sm:$0xff]  ;;  %v209_v56 = vld [vmem:[#allocation5 + $0x448] sm:$0xff]  ;;  %v211_v57 = vld [vmem:[#allocation5 + $0x458] sm:$0xff] }
  0x51   :  { %368 = vmatprep.subr.mxu0 %v289_v16  ;;  %445 = vmatprep.subr.mxu1 %v291_v17  ;;  %v208_v58 = vld [vmem:[#allocation5 + $0x440] sm:$0xff]  ;;  %v210_v59 = vld [vmem:[#allocation5 + $0x450] sm:$0xff]  ;;  %v201_v60 = vld [vmem:[#allocation5 + $0x408] sm:$0xff] }
  0x52   :  { %369 = vmatpush2.msra.mxu0 %v288_v18  ;;  %446 = vmatpush2.msra.mxu1 %v290_v19  ;;  %v203_v61 = vld [vmem:[#allocation5 + $0x418] sm:$0xff]  ;;  %v200_v62 = vld [vmem:[#allocation5 + $0x400] sm:$0xff]  ;;  %v1181_v63 = vld [vmem:[#allocation2 + $0x8] sm:$0xff] }
  0x53   :  { %370 = vmatprep.subr.mxu0 %v281_v20  ;;  %447 = vmatprep.subr.mxu1 %v283_v21  ;;  %v202_v0 = vld [vmem:[#allocation5 + $0x410] sm:$0xff]  ;;  %v1183_v1 = vld [vmem:[#allocation2] sm:$0xff]  ;;  %v197_v2 = vld [vmem:[#allocation5 + $0x3e8] sm:$0xff] }
  0x54   :  { %371 = vmatpush2.msra.mxu0 %v280_v22  ;;  %448 = vmatpush2.msra.mxu1 %v282_v23  ;;  %v199_v3 = vld [vmem:[#allocation5 + $0x3f8] sm:$0xff]  ;;  %v196_v4 = vld [vmem:[#allocation5 + $0x3e0] sm:$0xff]  ;;  %v198_v5 = vld [vmem:[#allocation5 + $0x3f0] sm:$0xff] }
  0x55   :  { %372 = vmatprep.subr.mxu0 %v273_v24  ;;  %449 = vmatprep.subr.mxu1 %v275_v25  ;;  %v189_v6 = vld [vmem:[#allocation5 + $0x3a8] sm:$0xff]  ;;  %v191_v7 = vld [vmem:[#allocation5 + $0x3b8] sm:$0xff]  ;;  %v188_v9 = vld [vmem:[#allocation5 + $0x3a0] sm:$0xff] }
  0x56   :  { %373 = vmatpush2.msra.mxu0 %v272_v26  ;;  %450 = vmatpush2.msra.mxu1 %v274_v27  ;;  %v1189_v8 = vld [vmem:[#allocation2 + $0x18] sm:$0xff]  ;;  %v190_v10 = vld [vmem:[#allocation5 + $0x3b0] sm:$0xff]  ;;  %v181_v12 = vld [vmem:[#allocation5 + $0x368] sm:$0xff] }
  0x57   :  { %374 = vmatprep.subr.mxu0 %v265_v28  ;;  %451 = vmatprep.subr.mxu1 %v267_v29  ;;  %v1191_v11 = vld [vmem:[#allocation2 + $0x10] sm:$0xff]  ;;  %v183_v13 = vld [vmem:[#allocation5 + $0x378] sm:$0xff]  ;;  %v180_v14 = vld [vmem:[#allocation5 + $0x360] sm:$0xff] }
  0x58   :  { %375 = vmatpush2.msra.mxu0 %v264_v30  ;;  %452 = vmatpush2.msra.mxu1 %v266_v31  ;;  %v182_v15 = vld [vmem:[#allocation5 + $0x370] sm:$0xff]  ;;  %v173_v16 = vld [vmem:[#allocation5 + $0x328] sm:$0xff]  ;;  %v175_v17 = vld [vmem:[#allocation5 + $0x338] sm:$0xff] }
  0x59   :  { %376 = vmatprep.subr.mxu0 %v257_v32  ;;  %453 = vmatprep.subr.mxu1 %v259_v33  ;;  %v172_v18 = vld [vmem:[#allocation5 + $0x320] sm:$0xff]  ;;  %v174_v19 = vld [vmem:[#allocation5 + $0x330] sm:$0xff]  ;;  %v165_v20 = vld [vmem:[#allocation5 + $0x2e8] sm:$0xff] }
  0x5a   :  { %377 = vmatpush2.msra.mxu0 %v256_v34  ;;  %454 = vmatpush2.msra.mxu1 %v258_v35  ;;  %v167_v21 = vld [vmem:[#allocation5 + $0x2f8] sm:$0xff]  ;;  %v164_v22 = vld [vmem:[#allocation5 + $0x2e0] sm:$0xff]  ;;  %v166_v23 = vld [vmem:[#allocation5 + $0x2f0] sm:$0xff] }
  0x5b   :  { %378 = vmatprep.subr.mxu0 %v249_v36  ;;  %455 = vmatprep.subr.mxu1 %v251_v37  ;;  %v157_v24 = vld [vmem:[#allocation5 + $0x2a8] sm:$0xff]  ;;  %v159_v25 = vld [vmem:[#allocation5 + $0x2b8] sm:$0xff]  ;;  %v156_v26 = vld [vmem:[#allocation5 + $0x2a0] sm:$0xff] }
  0x5c   :  { %379 = vmatpush2.msra.mxu0 %v248_v38  ;;  %456 = vmatpush2.msra.mxu1 %v250_v39  ;;  %v158_v27 = vld [vmem:[#allocation5 + $0x2b0] sm:$0xff]  ;;  %v149_v28 = vld [vmem:[#allocation5 + $0x268] sm:$0xff]  ;;  %v151_v29 = vld [vmem:[#allocation5 + $0x278] sm:$0xff] }
  0x5d   :  { %380 = vmatprep.subr.mxu0 %v241_v40  ;;  %457 = vmatprep.subr.mxu1 %v243_v41  ;;  %v148_v30 = vld [vmem:[#allocation5 + $0x260] sm:$0xff]  ;;  %v150_v31 = vld [vmem:[#allocation5 + $0x270] sm:$0xff]  ;;  %v141_v32 = vld [vmem:[#allocation5 + $0x228] sm:$0xff] }
  0x5e   :  { %381 = vmatpush2.msra.mxu0 %v240_v42  ;;  %458 = vmatpush2.msra.mxu1 %v242_v43  ;;  %v143_v33 = vld [vmem:[#allocation5 + $0x238] sm:$0xff]  ;;  %v140_v34 = vld [vmem:[#allocation5 + $0x220] sm:$0xff]  ;;  %v142_v35 = vld [vmem:[#allocation5 + $0x230] sm:$0xff] }
  0x5f   :  { %382 = vmatprep.subr.mxu0 %v233_v44  ;;  %459 = vmatprep.subr.mxu1 %v235_v45  ;;  %v133_v36 = vld [vmem:[#allocation5 + $0x1e8] sm:$0xff]  ;;  %v135_v37 = vld [vmem:[#allocation5 + $0x1f8] sm:$0xff]  ;;  %v132_v38 = vld [vmem:[#allocation5 + $0x1e0] sm:$0xff] }
  0x60   :  { %383 = vmatpush2.msra.mxu0 %v232_v46  ;;  %460 = vmatpush2.msra.mxu1 %v234_v47  ;;  %v134_v39 = vld [vmem:[#allocation5 + $0x1f0] sm:$0xff]  ;;  %v125_v40 = vld [vmem:[#allocation5 + $0x1a8] sm:$0xff]  ;;  %v127_v41 = vld [vmem:[#allocation5 + $0x1b8] sm:$0xff] }
  0x61   :  { %384 = vmatprep.subr.mxu0 %v225_v48  ;;  %461 = vmatprep.subr.mxu1 %v227_v49  ;;  %v124_v42 = vld [vmem:[#allocation5 + $0x1a0] sm:$0xff]  ;;  %v126_v43 = vld [vmem:[#allocation5 + $0x1b0] sm:$0xff]  ;;  %v117_v44 = vld [vmem:[#allocation5 + $0x168] sm:$0xff] }
  0x62   :  { %385 = vmatpush2.msra.mxu0 %v224_v50  ;;  %462 = vmatpush2.msra.mxu1 %v226_v51  ;;  %v119_v45 = vld [vmem:[#allocation5 + $0x178] sm:$0xff]  ;;  %v116_v46 = vld [vmem:[#allocation5 + $0x160] sm:$0xff]  ;;  %v118_v47 = vld [vmem:[#allocation5 + $0x170] sm:$0xff] }
  0x63   :  { %386 = vmatprep.subr.mxu0 %v217_v52  ;;  %463 = vmatprep.subr.mxu1 %v219_v53  ;;  %v109_v48 = vld [vmem:[#allocation5 + $0x128] sm:$0xff]  ;;  %v111_v49 = vld [vmem:[#allocation5 + $0x138] sm:$0xff]  ;;  %v108_v50 = vld [vmem:[#allocation5 + $0x120] sm:$0xff] }
  0x64   :  { %387 = vmatpush2.msra.mxu0 %v216_v54  ;;  %464 = vmatpush2.msra.mxu1 %v218_v55  ;;  %v110_v51 = vld [vmem:[#allocation5 + $0x130] sm:$0xff]  ;;  %v101_v52 = vld [vmem:[#allocation5 + $0xe8] sm:$0xff]  ;;  %v103_v53 = vld [vmem:[#allocation5 + $0xf8] sm:$0xff] }
  0x65   :  { %388 = vmatprep.subr.mxu0 %v209_v56  ;;  %465 = vmatprep.subr.mxu1 %v211_v57  ;;  %v100_v54 = vld [vmem:[#allocation5 + $0xe0] sm:$0xff]  ;;  %v102_v55 = vld [vmem:[#allocation5 + $0xf0] sm:$0xff]  ;;  %v93_v56 = vld [vmem:[#allocation5 + $0xa8] sm:$0xff] }
  0x66   :  { %389 = vmatpush2.msra.mxu0 %v208_v58  ;;  %466 = vmatpush2.msra.mxu1 %v210_v59  ;;  %v95_v57 = vld [vmem:[#allocation5 + $0xb8] sm:$0xff]  ;;  %v92_v58 = vld [vmem:[#allocation5 + $0xa0] sm:$0xff]  ;;  %v94_v59 = vld [vmem:[#allocation5 + $0xb0] sm:$0xff] }
  0x67   :  { %390 = vmatprep.subr.mxu0 %v201_v60  ;;  %467 = vmatprep.subr.mxu1 %v203_v61  ;;  %v85_v60 = vld [vmem:[#allocation5 + $0x68] sm:$0xff]  ;;  %v87_v61 = vld [vmem:[#allocation5 + $0x78] sm:$0xff] }
  0x68   :  { %391 = vmatpush2.msra.mxu0 %v200_v62  ;;  %392 = vmatprep.mubr.f32.mxu0 %v1181_v63  ;;  %v84_v62 = vld [vmem:[#allocation5 + $0x60] sm:$0xff] }
  0x69   :  { %468 = vmatpush2.msra.mxu1 %v202_v0  ;;  %469 = vmatprep.mubr.f32.mxu1 %v1181_v63  ;;  %v86_v0 = vld [vmem:[#allocation5 + $0x70] sm:$0xff] }
  0x6a   :  { %393 = vmatmul.mubr.f32.vlgmr.msra.gmra.mxu0 %v1183_v1  ;;  %470 = vmatmul.mubr.f32.vlgmr.msra.gmra.mxu1 %v1183_v1 }
  0x6b   :  { %482 = vmatprep.subr.mxu0 %v197_v2  ;;  %559 = vmatprep.subr.mxu1 %v199_v3  ;;  %v77_v2 = vld [vmem:[#allocation5 + $0x28] sm:$0xff]  ;;  %v79_v3 = vld [vmem:[#allocation5 + $0x38] sm:$0xff] }
  0x6c   :  { %483 = vmatpush1.msra.mxu0 %v196_v4  ;;  %560 = vmatpush1.msra.mxu1 %v198_v5  ;;  %v76_v4 = vld [vmem:[#allocation5 + $0x20] sm:$0xff]  ;;  %v78_v5 = vld [vmem:[#allocation5 + $0x30] sm:$0xff] }
  0x6d   :  { %484 = vmatprep.subr.mxu0 %v189_v6  ;;  %561 = vmatprep.subr.mxu1 %v191_v7  ;;  %v325_v6 = vld [vmem:[#allocation5 + $0x7e8] sm:$0xff]  ;;  %v327_v7 = vld [vmem:[#allocation5 + $0x7f8] sm:$0xff] }
  0x6e   :  { %398 = vmatprep.mubr.f32.mxu0 %v1189_v8  ;;  %475 = vmatprep.mubr.f32.mxu1 %v1189_v8 }
  0x6f   :  { %485 = vmatpush1.msra.mxu0 %v188_v9  ;;  %562 = vmatpush1.msra.mxu1 %v190_v10  ;;  %v324_v9 = vld [vmem:[#allocation5 + $0x7e0] sm:$0xff]  ;;  %v326_v10 = vld [vmem:[#allocation5 + $0x7f0] sm:$0xff] }
  0x70   :  { %399 = vmatmul.mubr.f32.gmra.mxu0 %v1191_v11  ;;  %476 = vmatmul.mubr.f32.gmra.mxu1 %v1191_v11 }
  0x71   :  { %486 = vmatprep.subr.mxu0 %v181_v12  ;;  %563 = vmatprep.subr.mxu1 %v183_v13  ;;  %v317_v12 = vld [vmem:[#allocation5 + $0x7a8] sm:$0xff]  ;;  %v319_v13 = vld [vmem:[#allocation5 + $0x7b8] sm:$0xff] }
  0x72   :  { %487 = vmatpush1.msra.mxu0 %v180_v14  ;;  %564 = vmatpush1.msra.mxu1 %v182_v15  ;;  %v316_v14 = vld [vmem:[#allocation5 + $0x7a0] sm:$0xff]  ;;  %v318_v15 = vld [vmem:[#allocation5 + $0x7b0] sm:$0xff] }
  0x73   :  { %488 = vmatprep.subr.mxu0 %v173_v16  ;;  %565 = vmatprep.subr.mxu1 %v175_v17  ;;  %v309_v16 = vld [vmem:[#allocation5 + $0x768] sm:$0xff]  ;;  %v311_v17 = vld [vmem:[#allocation5 + $0x778] sm:$0xff] }
  0x74   :  { %489 = vmatpush1.msra.mxu0 %v172_v18  ;;  %566 = vmatpush1.msra.mxu1 %v174_v19  ;;  %v308_v18 = vld [vmem:[#allocation5 + $0x760] sm:$0xff]  ;;  %v310_v19 = vld [vmem:[#allocation5 + $0x770] sm:$0xff] }
  0x75   :  { %490 = vmatprep.subr.mxu0 %v165_v20  ;;  %567 = vmatprep.subr.mxu1 %v167_v21  ;;  %v301_v20 = vld [vmem:[#allocation5 + $0x728] sm:$0xff]  ;;  %v303_v21 = vld [vmem:[#allocation5 + $0x738] sm:$0xff] }
  0x76   :  { %491 = vmatpush1.msra.mxu0 %v164_v22  ;;  %568 = vmatpush1.msra.mxu1 %v166_v23  ;;  %v300_v22 = vld [vmem:[#allocation5 + $0x720] sm:$0xff]  ;;  %v302_v23 = vld [vmem:[#allocation5 + $0x730] sm:$0xff] }
  0x77   :  { %492 = vmatprep.subr.mxu0 %v157_v24  ;;  %569 = vmatprep.subr.mxu1 %v159_v25  ;;  %v293_v24 = vld [vmem:[#allocation5 + $0x6e8] sm:$0xff]  ;;  %v295_v25 = vld [vmem:[#allocation5 + $0x6f8] sm:$0xff] }
  0x78   :  { %493 = vmatpush1.msra.mxu0 %v156_v26  ;;  %570 = vmatpush1.msra.mxu1 %v158_v27  ;;  %v292_v26 = vld [vmem:[#allocation5 + $0x6e0] sm:$0xff]  ;;  %v294_v27 = vld [vmem:[#allocation5 + $0x6f0] sm:$0xff] }
  0x79   :  { %494 = vmatprep.subr.mxu0 %v149_v28  ;;  %571 = vmatprep.subr.mxu1 %v151_v29  ;;  %v285_v28 = vld [vmem:[#allocation5 + $0x6a8] sm:$0xff]  ;;  %v287_v29 = vld [vmem:[#allocation5 + $0x6b8] sm:$0xff] }
  0x7a   :  { %495 = vmatpush1.msra.mxu0 %v148_v30  ;;  %572 = vmatpush1.msra.mxu1 %v150_v31  ;;  %v284_v30 = vld [vmem:[#allocation5 + $0x6a0] sm:$0xff]  ;;  %v286_v31 = vld [vmem:[#allocation5 + $0x6b0] sm:$0xff] }
  0x7b   :  { %496 = vmatprep.subr.mxu0 %v141_v32  ;;  %573 = vmatprep.subr.mxu1 %v143_v33  ;;  %v277_v32 = vld [vmem:[#allocation5 + $0x668] sm:$0xff]  ;;  %v279_v33 = vld [vmem:[#allocation5 + $0x678] sm:$0xff] }
  0x7c   :  { %497 = vmatpush1.msra.mxu0 %v140_v34  ;;  %574 = vmatpush1.msra.mxu1 %v142_v35  ;;  %v276_v34 = vld [vmem:[#allocation5 + $0x660] sm:$0xff]  ;;  %v278_v35 = vld [vmem:[#allocation5 + $0x670] sm:$0xff] }
  0x7d   :  { %498 = vmatprep.subr.mxu0 %v133_v36  ;;  %575 = vmatprep.subr.mxu1 %v135_v37  ;;  %v269_v36 = vld [vmem:[#allocation5 + $0x628] sm:$0xff]  ;;  %v271_v37 = vld [vmem:[#allocation5 + $0x638] sm:$0xff] }
  0x7e   :  { %499 = vmatpush1.msra.mxu0 %v132_v38  ;;  %576 = vmatpush1.msra.mxu1 %v134_v39  ;;  %v268_v38 = vld [vmem:[#allocation5 + $0x620] sm:$0xff]  ;;  %v270_v39 = vld [vmem:[#allocation5 + $0x630] sm:$0xff] }
  0x7f   :  { %500 = vmatprep.subr.mxu0 %v125_v40  ;;  %577 = vmatprep.subr.mxu1 %v127_v41  ;;  %v261_v40 = vld [vmem:[#allocation5 + $0x5e8] sm:$0xff]  ;;  %v263_v41 = vld [vmem:[#allocation5 + $0x5f8] sm:$0xff] }
  0x80   :  { %501 = vmatpush1.msra.mxu0 %v124_v42  ;;  %578 = vmatpush1.msra.mxu1 %v126_v43  ;;  %v260_v42 = vld [vmem:[#allocation5 + $0x5e0] sm:$0xff]  ;;  %v262_v43 = vld [vmem:[#allocation5 + $0x5f0] sm:$0xff] }
  0x81   :  { %502 = vmatprep.subr.mxu0 %v117_v44  ;;  %579 = vmatprep.subr.mxu1 %v119_v45  ;;  %v253_v44 = vld [vmem:[#allocation5 + $0x5a8] sm:$0xff]  ;;  %v255_v45 = vld [vmem:[#allocation5 + $0x5b8] sm:$0xff] }
  0x82   :  { %503 = vmatpush1.msra.mxu0 %v116_v46  ;;  %580 = vmatpush1.msra.mxu1 %v118_v47  ;;  %v252_v46 = vld [vmem:[#allocation5 + $0x5a0] sm:$0xff]  ;;  %v254_v47 = vld [vmem:[#allocation5 + $0x5b0] sm:$0xff] }
  0x83   :  { %504 = vmatprep.subr.mxu0 %v109_v48  ;;  %581 = vmatprep.subr.mxu1 %v111_v49  ;;  %v245_v48 = vld [vmem:[#allocation5 + $0x568] sm:$0xff]  ;;  %v247_v49 = vld [vmem:[#allocation5 + $0x578] sm:$0xff] }
  0x84   :  { %505 = vmatpush1.msra.mxu0 %v108_v50  ;;  %582 = vmatpush1.msra.mxu1 %v110_v51  ;;  %v244_v50 = vld [vmem:[#allocation5 + $0x560] sm:$0xff]  ;;  %v246_v51 = vld [vmem:[#allocation5 + $0x570] sm:$0xff] }
  0x85   :  { %506 = vmatprep.subr.mxu0 %v101_v52  ;;  %583 = vmatprep.subr.mxu1 %v103_v53  ;;  %v237_v52 = vld [vmem:[#allocation5 + $0x528] sm:$0xff]  ;;  %v239_v53 = vld [vmem:[#allocation5 + $0x538] sm:$0xff] }
  0x86   :  { %507 = vmatpush1.msra.mxu0 %v100_v54  ;;  %584 = vmatpush1.msra.mxu1 %v102_v55  ;;  %v236_v54 = vld [vmem:[#allocation5 + $0x520] sm:$0xff]  ;;  %v238_v55 = vld [vmem:[#allocation5 + $0x530] sm:$0xff] }
  0x87   :  { %508 = vmatprep.subr.mxu0 %v93_v56  ;;  %585 = vmatprep.subr.mxu1 %v95_v57  ;;  %v229_v56 = vld [vmem:[#allocation5 + $0x4e8] sm:$0xff]  ;;  %v231_v57 = vld [vmem:[#allocation5 + $0x4f8] sm:$0xff] }
  0x88   :  { %509 = vmatpush1.msra.mxu0 %v92_v58  ;;  %586 = vmatpush1.msra.mxu1 %v94_v59  ;;  %v228_v58 = vld [vmem:[#allocation5 + $0x4e0] sm:$0xff]  ;;  %v230_v59 = vld [vmem:[#allocation5 + $0x4f0] sm:$0xff] }
  0x89   :  { %510 = vmatprep.subr.mxu0 %v85_v60  ;;  %587 = vmatprep.subr.mxu1 %v87_v61  ;;  %v221_v60 = vld [vmem:[#allocation5 + $0x4a8] sm:$0xff]  ;;  %v223_v61 = vld [vmem:[#allocation5 + $0x4b8] sm:$0xff] }
  0x8a   :  { %511 = vmatpush1.msra.mxu0 %v84_v62  ;;  %588 = vmatpush1.msra.mxu1 %v86_v0  ;;  %v220_v62 = vld [vmem:[#allocation5 + $0x4a0] sm:$0xff]  ;;  %v222_v0 = vld [vmem:[#allocation5 + $0x4b0] sm:$0xff] }
  0x8b   :  { %512 = vmatprep.subr.mxu0 %v77_v2  ;;  %589 = vmatprep.subr.mxu1 %v79_v3  ;;  %v213_v2 = vld [vmem:[#allocation5 + $0x468] sm:$0xff]  ;;  %v215_v3 = vld [vmem:[#allocation5 + $0x478] sm:$0xff] }
  0x8c   :  { %513 = vmatpush1.msra.mxu0 %v76_v4  ;;  %590 = vmatpush1.msra.mxu1 %v78_v5  ;;  %v212_v4 = vld [vmem:[#allocation5 + $0x460] sm:$0xff]  ;;  %v214_v5 = vld [vmem:[#allocation5 + $0x470] sm:$0xff] }
  0x8d   :  { %514 = vmatprep.subr.mxu0 %v325_v6  ;;  %591 = vmatprep.subr.mxu1 %v327_v7  ;;  %v205_v6 = vld [vmem:[#allocation5 + $0x428] sm:$0xff]  ;;  %v207_v7 = vld [vmem:[#allocation5 + $0x438] sm:$0xff] }
  0x8e   :  { %515 = vmatpush2.msra.mxu0 %v324_v9  ;;  %592 = vmatpush2.msra.mxu1 %v326_v10  ;;  %v204_v9 = vld [vmem:[#allocation5 + $0x420] sm:$0xff]  ;;  %v206_v10 = vld [vmem:[#allocation5 + $0x430] sm:$0xff] }
  0x8f   :  { %516 = vmatprep.subr.mxu0 %v317_v12  ;;  %593 = vmatprep.subr.mxu1 %v319_v13  ;;  %v731_v12 = vld [vmem:[#allocation7 + $0xf8] sm:$0xff] }
  0x90   :  { %517 = vmatpush2.msra.mxu0 %v316_v14  ;;  %594 = vmatpush2.msra.mxu1 %v318_v15  ;;  %v795_v13 = vld [vmem:[#allocation7 + $0x2f8] sm:$0xff]  ;;  %v730_v14 = vld [vmem:[#allocation7 + $0xf0] sm:$0xff] }
  0x91   :  { %518 = vmatprep.subr.mxu0 %v309_v16  ;;  %595 = vmatprep.subr.mxu1 %v311_v17  ;;  %v794_v15 = vld [vmem:[#allocation7 + $0x2f0] sm:$0xff]  ;;  %v793_v16 = vld [vmem:[#allocation7 + $0x2e8] sm:$0xff]  ;;  %v792_v17 = vld [vmem:[#allocation7 + $0x2e0] sm:$0xff] }
  0x92   :  { %519 = vmatpush2.msra.mxu0 %v308_v18  ;;  %596 = vmatpush2.msra.mxu1 %v310_v19  ;;  %v791_v18 = vld [vmem:[#allocation7 + $0x2d8] sm:$0xff]  ;;  %v790_v19 = vld [vmem:[#allocation7 + $0x2d0] sm:$0xff] }
  0x93   :  { %520 = vmatprep.subr.mxu0 %v301_v20  ;;  %597 = vmatprep.subr.mxu1 %v303_v21  ;;  %v725_v20 = vld [vmem:[#allocation7 + $0xc8] sm:$0xff] }
  0x94   :  { %521 = vmatpush2.msra.mxu0 %v300_v22  ;;  %598 = vmatpush2.msra.mxu1 %v302_v23  ;;  %v789_v21 = vld [vmem:[#allocation7 + $0x2c8] sm:$0xff]  ;;  %v724_v22 = vld [vmem:[#allocation7 + $0xc0] sm:$0xff] }
  0x95   :  { %522 = vmatprep.subr.mxu0 %v293_v24  ;;  %599 = vmatprep.subr.mxu1 %v295_v25  ;;  %v788_v23 = vld [vmem:[#allocation7 + $0x2c0] sm:$0xff]  ;;  %v723_v24 = vld [vmem:[#allocation7 + $0xb8] sm:$0xff] }
  0x96   :  { %523 = vmatpush2.msra.mxu0 %v292_v26  ;;  %600 = vmatpush2.msra.mxu1 %v294_v27  ;;  %v787_v25 = vld [vmem:[#allocation7 + $0x2b8] sm:$0xff]  ;;  %v722_v26 = vld [vmem:[#allocation7 + $0xb0] sm:$0xff] }
  0x97   :  { %524 = vmatprep.subr.mxu0 %v285_v28  ;;  %601 = vmatprep.subr.mxu1 %v287_v29  ;;  %v786_v27 = vld [vmem:[#allocation7 + $0x2b0] sm:$0xff]  ;;  %v721_v28 = vld [vmem:[#allocation7 + $0xa8] sm:$0xff] }
  0x98   :  { %525 = vmatpush2.msra.mxu0 %v284_v30  ;;  %602 = vmatpush2.msra.mxu1 %v286_v31  ;;  %v785_v29 = vld [vmem:[#allocation7 + $0x2a8] sm:$0xff]  ;;  %v720_v30 = vld [vmem:[#allocation7 + $0xa0] sm:$0xff] }
  0x99   :  { %526 = vmatprep.subr.mxu0 %v277_v32  ;;  %603 = vmatprep.subr.mxu1 %v279_v33  ;;  %v784_v31 = vld [vmem:[#allocation7 + $0x2a0] sm:$0xff]  ;;  %v719_v32 = vld [vmem:[#allocation7 + $0x98] sm:$0xff] }
  0x9a   :  { %527 = vmatpush2.msra.mxu0 %v276_v34  ;;  %604 = vmatpush2.msra.mxu1 %v278_v35  ;;  %v783_v33 = vld [vmem:[#allocation7 + $0x298] sm:$0xff]  ;;  %v718_v34 = vld [vmem:[#allocation7 + $0x90] sm:$0xff] }
  0x9b   :  { %528 = vmatprep.subr.mxu0 %v269_v36  ;;  %605 = vmatprep.subr.mxu1 %v271_v37  ;;  %v782_v35 = vld [vmem:[#allocation7 + $0x290] sm:$0xff]  ;;  %v717_v36 = vld [vmem:[#allocation7 + $0x88] sm:$0xff] }
  0x9c   :  { %529 = vmatpush2.msra.mxu0 %v268_v38  ;;  %606 = vmatpush2.msra.mxu1 %v270_v39  ;;  %v781_v37 = vld [vmem:[#allocation7 + $0x288] sm:$0xff]  ;;  %v716_v38 = vld [vmem:[#allocation7 + $0x80] sm:$0xff] }
  0x9d   :  { %530 = vmatprep.subr.mxu0 %v261_v40  ;;  %607 = vmatprep.subr.mxu1 %v263_v41  ;;  %v780_v39 = vld [vmem:[#allocation7 + $0x280] sm:$0xff]  ;;  %v715_v40 = vld [vmem:[#allocation7 + $0x78] sm:$0xff] }
  0x9e   :  { %531 = vmatpush2.msra.mxu0 %v260_v42  ;;  %608 = vmatpush2.msra.mxu1 %v262_v43  ;;  %v779_v41 = vld [vmem:[#allocation7 + $0x278] sm:$0xff]  ;;  %v714_v42 = vld [vmem:[#allocation7 + $0x70] sm:$0xff] }
  0x9f   :  { %532 = vmatprep.subr.mxu0 %v253_v44  ;;  %609 = vmatprep.subr.mxu1 %v255_v45  ;;  %v778_v43 = vld [vmem:[#allocation7 + $0x270] sm:$0xff]  ;;  %v713_v44 = vld [vmem:[#allocation7 + $0x68] sm:$0xff] }
  0xa0   :  { %533 = vmatpush2.msra.mxu0 %v252_v46  ;;  %610 = vmatpush2.msra.mxu1 %v254_v47  ;;  %v777_v45 = vld [vmem:[#allocation7 + $0x268] sm:$0xff]  ;;  %v712_v46 = vld [vmem:[#allocation7 + $0x60] sm:$0xff] }
  0xa1   :  { %534 = vmatprep.subr.mxu0 %v245_v48  ;;  %611 = vmatprep.subr.mxu1 %v247_v49  ;;  %v776_v47 = vld [vmem:[#allocation7 + $0x260] sm:$0xff]  ;;  %v711_v48 = vld [vmem:[#allocation7 + $0x58] sm:$0xff] }
  0xa2   :  { %535 = vmatpush2.msra.mxu0 %v244_v50  ;;  %612 = vmatpush2.msra.mxu1 %v246_v51  ;;  %v775_v49 = vld [vmem:[#allocation7 + $0x258] sm:$0xff]  ;;  %v710_v50 = vld [vmem:[#allocation7 + $0x50] sm:$0xff] }
  0xa3   :  { %536 = vmatprep.subr.mxu0 %v237_v52  ;;  %613 = vmatprep.subr.mxu1 %v239_v53  ;;  %v774_v51 = vld [vmem:[#allocation7 + $0x250] sm:$0xff]  ;;  %v709_v52 = vld [vmem:[#allocation7 + $0x48] sm:$0xff] }
  0xa4   :  { %537 = vmatpush2.msra.mxu0 %v236_v54  ;;  %614 = vmatpush2.msra.mxu1 %v238_v55  ;;  %v773_v53 = vld [vmem:[#allocation7 + $0x248] sm:$0xff]  ;;  %v708_v54 = vld [vmem:[#allocation7 + $0x40] sm:$0xff] }
  0xa5   :  { %538 = vmatprep.subr.mxu0 %v229_v56  ;;  %615 = vmatprep.subr.mxu1 %v231_v57  ;;  %v772_v55 = vld [vmem:[#allocation7 + $0x240] sm:$0xff]  ;;  %v707_v56 = vld [vmem:[#allocation7 + $0x38] sm:$0xff] }
  0xa6   :  { %539 = vmatpush2.msra.mxu0 %v228_v58  ;;  %616 = vmatpush2.msra.mxu1 %v230_v59  ;;  %v771_v57 = vld [vmem:[#allocation7 + $0x238] sm:$0xff]  ;;  %v706_v58 = vld [vmem:[#allocation7 + $0x30] sm:$0xff] }
  0xa7   :  { %540 = vmatprep.subr.mxu0 %v221_v60  ;;  %617 = vmatprep.subr.mxu1 %v223_v61  ;;  %v770_v59 = vld [vmem:[#allocation7 + $0x230] sm:$0xff]  ;;  %v705_v60 = vld [vmem:[#allocation7 + $0x28] sm:$0xff] }
  0xa8   :  { %541 = vmatpush2.msra.mxu0 %v220_v62  ;;  %618 = vmatpush2.msra.mxu1 %v222_v0  ;;  %v769_v61 = vld [vmem:[#allocation7 + $0x228] sm:$0xff]  ;;  %v704_v62 = vld [vmem:[#allocation7 + $0x20] sm:$0xff] }
  0xa9   :  { %542 = vmatprep.subr.mxu0 %v213_v2  ;;  %619 = vmatprep.subr.mxu1 %v215_v3  ;;  %v768_v0 = vld [vmem:[#allocation7 + $0x220] sm:$0xff]  ;;  %v703_v2 = vld [vmem:[#allocation7 + $0x18] sm:$0xff] }
  0xaa   :  { %543 = vmatpush2.msra.mxu0 %v212_v4  ;;  %620 = vmatpush2.msra.mxu1 %v214_v5  ;;  %v767_v3 = vld [vmem:[#allocation7 + $0x218] sm:$0xff]  ;;  %v702_v4 = vld [vmem:[#allocation7 + $0x10] sm:$0xff] }
  0xab   :  { %544 = vmatprep.subr.mxu0 %v205_v6  ;;  %621 = vmatprep.subr.mxu1 %v207_v7  ;;  %v766_v5 = vld [vmem:[#allocation7 + $0x210] sm:$0xff]  ;;  %v701_v6 = vld [vmem:[#allocation7 + $0x8] sm:$0xff] }
  0xac   :  { %545 = vmatpush2.msra.mxu0 %v204_v9  ;;  %546 = vmatprep.mubr.f32.mxu0 %v1181_v63  ;;  %v765_v7 = vld [vmem:[#allocation7 + $0x208] sm:$0xff]  ;;  %v700_v9 = vld [vmem:[#allocation7] sm:$0xff] }
  0xad   :  { %622 = vmatpush2.msra.mxu1 %v206_v10  ;;  %623 = vmatprep.mubr.f32.mxu1 %v1181_v63  ;;  %v729_v63 = vld [vmem:[#allocation7 + $0xe8] sm:$0xff]  ;;  %v764_v10 = vld [vmem:[#allocation7 + $0x200] sm:$0xff] }
  0xae   :  { %547 = vmatmul.mubr.f32.vlgmr.msra.gmra.mxu0 %v1183_v1  ;;  %624 = vmatmul.mubr.f32.vlgmr.msra.gmra.mxu1 %v1183_v1  ;;  %v728_v1 = vld [vmem:[#allocation7 + $0xe0] sm:$0xff] }
  0xaf   :  { %552 = vmatprep.mubr.f32.mxu0 %v1189_v8  ;;  %629 = vmatprep.mubr.f32.mxu1 %v1189_v8  ;;  %v727_v8 = vld [vmem:[#allocation7 + $0xd8] sm:$0xff] }
  0xb0   :  { %828 = vmatprep.subr.mxu0 %v731_v12  ;;  %905 = vmatprep.subr.mxu1 %v795_v13  ;;  %v763_v12 = vld [vmem:[#allocation7 + $0x1f8] sm:$0xff] }
  0xb1   :  { %829 = vmatpush1.msra.mxu0 %v730_v14  ;;  %906 = vmatpush1.msra.mxu1 %v794_v15  ;;  %v827_v13 = vld [vmem:[#allocation7 + $0x3f8] sm:$0xff]  ;;  %v762_v14 = vld [vmem:[#allocation7 + $0x1f0] sm:$0xff] }
  0xb2   :  { %553 = vmatmul.mubr.f32.gmra.mxu0 %v1191_v11  ;;  %630 = vmatmul.mubr.f32.gmra.mxu1 %v1191_v11  ;;  %v726_v11 = vld [vmem:[#allocation7 + $0xd0] sm:$0xff] }
  0xb3   :  { %830 = vmatprep.subr.mxu0 %v729_v63  ;;  %907 = vmatprep.subr.mxu1 %v793_v16  ;;  %v826_v15 = vld [vmem:[#allocation7 + $0x3f0] sm:$0xff]  ;;  %v761_v63 = vld [vmem:[#allocation7 + $0x1e8] sm:$0xff] }
  0xb4   :  { %831 = vmatpush1.msra.mxu0 %v728_v1  ;;  %908 = vmatpush1.msra.mxu1 %v792_v17  ;;  %v825_v16 = vld [vmem:[#allocation7 + $0x3e8] sm:$0xff]  ;;  %v760_v1 = vld [vmem:[#allocation7 + $0x1e0] sm:$0xff] }
  0xb5   :  { %832 = vmatprep.subr.mxu0 %v727_v8  ;;  %909 = vmatprep.subr.mxu1 %v791_v18  ;;  %v824_v17 = vld [vmem:[#allocation7 + $0x3e0] sm:$0xff]  ;;  %v759_v8 = vld [vmem:[#allocation7 + $0x1d8] sm:$0xff] }
  0xb6   :  { %833 = vmatpush1.msra.mxu0 %v726_v11  ;;  %910 = vmatpush1.msra.mxu1 %v790_v19  ;;  %v823_v18 = vld [vmem:[#allocation7 + $0x3d8] sm:$0xff]  ;;  %v758_v11 = vld [vmem:[#allocation7 + $0x1d0] sm:$0xff] }
  0xb7   :  { %834 = vmatprep.subr.mxu0 %v725_v20  ;;  %911 = vmatprep.subr.mxu1 %v789_v21  ;;  %v822_v19 = vld [vmem:[#allocation7 + $0x3d0] sm:$0xff]  ;;  %v757_v20 = vld [vmem:[#allocation7 + $0x1c8] sm:$0xff] }
  0xb8   :  { %835 = vmatpush1.msra.mxu0 %v724_v22  ;;  %912 = vmatpush1.msra.mxu1 %v788_v23  ;;  %v821_v21 = vld [vmem:[#allocation7 + $0x3c8] sm:$0xff]  ;;  %v756_v22 = vld [vmem:[#allocation7 + $0x1c0] sm:$0xff] }
  0xb9   :  { %836 = vmatprep.subr.mxu0 %v723_v24  ;;  %913 = vmatprep.subr.mxu1 %v787_v25  ;;  %v820_v23 = vld [vmem:[#allocation7 + $0x3c0] sm:$0xff]  ;;  %v755_v24 = vld [vmem:[#allocation7 + $0x1b8] sm:$0xff] }
  0xba   :  { %837 = vmatpush1.msra.mxu0 %v722_v26  ;;  %914 = vmatpush1.msra.mxu1 %v786_v27  ;;  %v819_v25 = vld [vmem:[#allocation7 + $0x3b8] sm:$0xff]  ;;  %v754_v26 = vld [vmem:[#allocation7 + $0x1b0] sm:$0xff] }
  0xbb   :  { %838 = vmatprep.subr.mxu0 %v721_v28  ;;  %915 = vmatprep.subr.mxu1 %v785_v29  ;;  %v818_v27 = vld [vmem:[#allocation7 + $0x3b0] sm:$0xff]  ;;  %v753_v28 = vld [vmem:[#allocation7 + $0x1a8] sm:$0xff] }
  0xbc   :  { %839 = vmatpush1.msra.mxu0 %v720_v30  ;;  %916 = vmatpush1.msra.mxu1 %v784_v31  ;;  %v817_v29 = vld [vmem:[#allocation7 + $0x3a8] sm:$0xff]  ;;  %v752_v30 = vld [vmem:[#allocation7 + $0x1a0] sm:$0xff] }
  0xbd   :  { %840 = vmatprep.subr.mxu0 %v719_v32  ;;  %917 = vmatprep.subr.mxu1 %v783_v33  ;;  %v816_v31 = vld [vmem:[#allocation7 + $0x3a0] sm:$0xff]  ;;  %v751_v32 = vld [vmem:[#allocation7 + $0x198] sm:$0xff] }
  0xbe   :  { %841 = vmatpush1.msra.mxu0 %v718_v34  ;;  %918 = vmatpush1.msra.mxu1 %v782_v35  ;;  %v815_v33 = vld [vmem:[#allocation7 + $0x398] sm:$0xff]  ;;  %v750_v34 = vld [vmem:[#allocation7 + $0x190] sm:$0xff] }
  0xbf   :  { %842 = vmatprep.subr.mxu0 %v717_v36  ;;  %919 = vmatprep.subr.mxu1 %v781_v37  ;;  %v814_v35 = vld [vmem:[#allocation7 + $0x390] sm:$0xff]  ;;  %v749_v36 = vld [vmem:[#allocation7 + $0x188] sm:$0xff] }
  0xc0   :  { %843 = vmatpush1.msra.mxu0 %v716_v38  ;;  %920 = vmatpush1.msra.mxu1 %v780_v39  ;;  %v813_v37 = vld [vmem:[#allocation7 + $0x388] sm:$0xff]  ;;  %v748_v38 = vld [vmem:[#allocation7 + $0x180] sm:$0xff] }
  0xc1   :  { %844 = vmatprep.subr.mxu0 %v715_v40  ;;  %921 = vmatprep.subr.mxu1 %v779_v41  ;;  %v812_v39 = vld [vmem:[#allocation7 + $0x380] sm:$0xff]  ;;  %v747_v40 = vld [vmem:[#allocation7 + $0x178] sm:$0xff] }
  0xc2   :  { %845 = vmatpush1.msra.mxu0 %v714_v42  ;;  %922 = vmatpush1.msra.mxu1 %v778_v43  ;;  %v811_v41 = vld [vmem:[#allocation7 + $0x378] sm:$0xff]  ;;  %v746_v42 = vld [vmem:[#allocation7 + $0x170] sm:$0xff] }
  0xc3   :  { %846 = vmatprep.subr.mxu0 %v713_v44  ;;  %923 = vmatprep.subr.mxu1 %v777_v45  ;;  %v810_v43 = vld [vmem:[#allocation7 + $0x370] sm:$0xff]  ;;  %v745_v44 = vld [vmem:[#allocation7 + $0x168] sm:$0xff] }
  0xc4   :  { %847 = vmatpush1.msra.mxu0 %v712_v46  ;;  %924 = vmatpush1.msra.mxu1 %v776_v47  ;;  %v809_v45 = vld [vmem:[#allocation7 + $0x368] sm:$0xff]  ;;  %v744_v46 = vld [vmem:[#allocation7 + $0x160] sm:$0xff] }
  0xc5   :  { %848 = vmatprep.subr.mxu0 %v711_v48  ;;  %925 = vmatprep.subr.mxu1 %v775_v49  ;;  %v808_v47 = vld [vmem:[#allocation7 + $0x360] sm:$0xff]  ;;  %v743_v48 = vld [vmem:[#allocation7 + $0x158] sm:$0xff] }
  0xc6   :  { %849 = vmatpush1.msra.mxu0 %v710_v50  ;;  %926 = vmatpush1.msra.mxu1 %v774_v51  ;;  %v807_v49 = vld [vmem:[#allocation7 + $0x358] sm:$0xff]  ;;  %v742_v50 = vld [vmem:[#allocation7 + $0x150] sm:$0xff] }
  0xc7   :  { %850 = vmatprep.subr.mxu0 %v709_v52  ;;  %927 = vmatprep.subr.mxu1 %v773_v53  ;;  %v806_v51 = vld [vmem:[#allocation7 + $0x350] sm:$0xff]  ;;  %v741_v52 = vld [vmem:[#allocation7 + $0x148] sm:$0xff] }
  0xc8   :  { %851 = vmatpush1.msra.mxu0 %v708_v54  ;;  %928 = vmatpush1.msra.mxu1 %v772_v55  ;;  %v805_v53 = vld [vmem:[#allocation7 + $0x348] sm:$0xff]  ;;  %v740_v54 = vld [vmem:[#allocation7 + $0x140] sm:$0xff] }
  0xc9   :  { %852 = vmatprep.subr.mxu0 %v707_v56  ;;  %929 = vmatprep.subr.mxu1 %v771_v57  ;;  %v804_v55 = vld [vmem:[#allocation7 + $0x340] sm:$0xff]  ;;  %v739_v56 = vld [vmem:[#allocation7 + $0x138] sm:$0xff] }
  0xca   :  { %853 = vmatpush1.msra.mxu0 %v706_v58  ;;  %930 = vmatpush1.msra.mxu1 %v770_v59  ;;  %v803_v57 = vld [vmem:[#allocation7 + $0x338] sm:$0xff]  ;;  %v738_v58 = vld [vmem:[#allocation7 + $0x130] sm:$0xff] }
  0xcb   :  { %854 = vmatprep.subr.mxu0 %v705_v60  ;;  %931 = vmatprep.subr.mxu1 %v769_v61  ;;  %v802_v59 = vld [vmem:[#allocation7 + $0x330] sm:$0xff]  ;;  %v737_v60 = vld [vmem:[#allocation7 + $0x128] sm:$0xff] }
  0xcc   :  { %855 = vmatpush1.msra.mxu0 %v704_v62  ;;  %932 = vmatpush1.msra.mxu1 %v768_v0  ;;  %v801_v61 = vld [vmem:[#allocation7 + $0x328] sm:$0xff]  ;;  %v736_v62 = vld [vmem:[#allocation7 + $0x120] sm:$0xff] }
  0xcd   :  { %856 = vmatprep.subr.mxu0 %v703_v2  ;;  %933 = vmatprep.subr.mxu1 %v767_v3  ;;  %v800_v0 = vld [vmem:[#allocation7 + $0x320] sm:$0xff]  ;;  %v735_v2 = vld [vmem:[#allocation7 + $0x118] sm:$0xff] }
  0xce   :  { %857 = vmatpush1.msra.mxu0 %v702_v4  ;;  %934 = vmatpush1.msra.mxu1 %v766_v5  ;;  %v799_v3 = vld [vmem:[#allocation7 + $0x318] sm:$0xff]  ;;  %v734_v4 = vld [vmem:[#allocation7 + $0x110] sm:$0xff] }
  0xcf   :  { %858 = vmatprep.subr.mxu0 %v701_v6  ;;  %935 = vmatprep.subr.mxu1 %v765_v7  ;;  %v798_v5 = vld [vmem:[#allocation7 + $0x310] sm:$0xff]  ;;  %v733_v6 = vld [vmem:[#allocation7 + $0x108] sm:$0xff] }
  0xd0   :  { %859 = vmatpush1.msra.mxu0 %v700_v9  ;;  %936 = vmatpush1.msra.mxu1 %v764_v10  ;;  %v797_v7 = vld [vmem:[#allocation7 + $0x308] sm:$0xff]  ;;  %v732_v9 = vld [vmem:[#allocation7 + $0x100] sm:$0xff] }
  0xd1   :  { %860 = vmatprep.subr.mxu0 %v763_v12  ;;  %937 = vmatprep.subr.mxu1 %v827_v13  ;;  %v796_v10 = vld [vmem:[#allocation7 + $0x300] sm:$0xff] }
  0xd2   :  { %861 = vmatpush2.msra.mxu0 %v762_v14  ;;  %938 = vmatpush2.msra.mxu1 %v826_v15 }
  0xd3   :  { %862 = vmatprep.subr.mxu0 %v761_v63  ;;  %939 = vmatprep.subr.mxu1 %v825_v16 }
  0xd4   :  { %863 = vmatpush2.msra.mxu0 %v760_v1  ;;  %940 = vmatpush2.msra.mxu1 %v824_v17 }
  0xd5   :  { %864 = vmatprep.subr.mxu0 %v759_v8  ;;  %941 = vmatprep.subr.mxu1 %v823_v18 }
  0xd6   :  { %865 = vmatpush2.msra.mxu0 %v758_v11  ;;  %942 = vmatpush2.msra.mxu1 %v822_v19 }
  0xd7   :  { %866 = vmatprep.subr.mxu0 %v757_v20  ;;  %943 = vmatprep.subr.mxu1 %v821_v21 }
  0xd8   :  { %867 = vmatpush2.msra.mxu0 %v756_v22  ;;  %944 = vmatpush2.msra.mxu1 %v820_v23 }
  0xd9   :  { %868 = vmatprep.subr.mxu0 %v755_v24  ;;  %945 = vmatprep.subr.mxu1 %v819_v25 }
  0xda   :  { %869 = vmatpush2.msra.mxu0 %v754_v26  ;;  %946 = vmatpush2.msra.mxu1 %v818_v27 }
  0xdb   :  { %870 = vmatprep.subr.mxu0 %v753_v28  ;;  %947 = vmatprep.subr.mxu1 %v817_v29 }
  0xdc   :  { %871 = vmatpush2.msra.mxu0 %v752_v30  ;;  %948 = vmatpush2.msra.mxu1 %v816_v31 }
  0xdd   :  { %872 = vmatprep.subr.mxu0 %v751_v32  ;;  %949 = vmatprep.subr.mxu1 %v815_v33 }
  0xde   :  { %873 = vmatpush2.msra.mxu0 %v750_v34  ;;  %950 = vmatpush2.msra.mxu1 %v814_v35 }
  0xdf   :  { %874 = vmatprep.subr.mxu0 %v749_v36  ;;  %951 = vmatprep.subr.mxu1 %v813_v37 }
  0xe0   :  { %875 = vmatpush2.msra.mxu0 %v748_v38  ;;  %952 = vmatpush2.msra.mxu1 %v812_v39 }
  0xe1   :  { %876 = vmatprep.subr.mxu0 %v747_v40  ;;  %953 = vmatprep.subr.mxu1 %v811_v41 }
  0xe2   :  { %877 = vmatpush2.msra.mxu0 %v746_v42  ;;  %954 = vmatpush2.msra.mxu1 %v810_v43 }
  0xe3   :  { %878 = vmatprep.subr.mxu0 %v745_v44  ;;  %955 = vmatprep.subr.mxu1 %v809_v45 }
  0xe4   :  { %879 = vmatpush2.msra.mxu0 %v744_v46  ;;  %956 = vmatpush2.msra.mxu1 %v808_v47 }
  0xe5   :  { %880 = vmatprep.subr.mxu0 %v743_v48  ;;  %957 = vmatprep.subr.mxu1 %v807_v49 }
  0xe6   :  { %881 = vmatpush2.msra.mxu0 %v742_v50  ;;  %958 = vmatpush2.msra.mxu1 %v806_v51 }
  0xe7   :  { %882 = vmatprep.subr.mxu0 %v741_v52  ;;  %959 = vmatprep.subr.mxu1 %v805_v53 }
  0xe8   :  { %883 = vmatpush2.msra.mxu0 %v740_v54  ;;  %960 = vmatpush2.msra.mxu1 %v804_v55 }
  0xe9   :  { %884 = vmatprep.subr.mxu0 %v739_v56  ;;  %961 = vmatprep.subr.mxu1 %v803_v57 }
  0xea   :  { %885 = vmatpush2.msra.mxu0 %v738_v58  ;;  %962 = vmatpush2.msra.mxu1 %v802_v59 }
  0xeb   :  { %886 = vmatprep.subr.mxu0 %v737_v60  ;;  %963 = vmatprep.subr.mxu1 %v801_v61 }
  0xec   :  { %887 = vmatpush2.msra.mxu0 %v736_v62  ;;  %964 = vmatpush2.msra.mxu1 %v800_v0 }
  0xed   :  { %888 = vmatprep.subr.mxu0 %v735_v2  ;;  %965 = vmatprep.subr.mxu1 %v799_v3 }
  0xee   :  { %889 = vmatpush2.msra.mxu0 %v734_v4  ;;  %966 = vmatpush2.msra.mxu1 %v798_v5 }
  0xef   :  { %890 = vmatprep.subr.mxu0 %v733_v6  ;;  %967 = vmatprep.subr.mxu1 %v797_v7 }
  0xf0   :  { %891 = vmatpush2.msra.mxu0 %v732_v9  ;;  %968 = vmatpush2.msra.mxu1 %v796_v10 }
 0x12a   :  { %v394_v12 = vpop.f32.mrf.mxu0  ;;  %v471_v13 = vpop.f32.mrf.mxu1 }
 0x12b   :  { %v1004_v1 = vmul.f32 -1.442695, %v394_v12  ;;  %v1006_v11 = vmul.f32 -1.442695, %v471_v13 }
 0x12c   :  { %v396_v14 = vpop.f32.mrf.mxu0  ;;  %v473_v15 = vpop.f32.mrf.mxu1 }
 0x12d   :  { %v1005_v17 = vmul.f32 -1.442695, %v396_v14  ;;  %v1007_v8 = vmul.f32 -1.442695, %v473_v15  ;;  %1020 = vpow2.f32 %v1004_v1 }
 0x12f   :  { %1022 = vpow2.f32 %v1005_v17 }
 0x130   :  { %v1205_v63 = vpop.f32.mrf.mxu0  ;;  %v1207_v16 = vpop.f32.mrf.mxu1  ;;  %1024 = vpow2.f32 %v1007_v8 }
 0x131   :  { %v1008_v20 = vmul.f32 -1.442695, %v1205_v63  ;;  %1026 = vpow2.f32 %v1006_v11  ;;  %v1010_v23 = vmul.f32 -1.442695, %v1207_v16 }
 0x132   :  { %v402_v18 = vpop.f32.mrf.mxu0  ;;  %v479_v19 = vpop.f32.mrf.mxu1 }
 0x133   :  { %v1009_v21 = vmul.f32 -1.442695, %v402_v18  ;;  %v1011_v22 = vmul.f32 -1.442695, %v479_v19  ;;  %1028 = vpow2.f32 %v1008_v20 }
 0x135   :  { %1030 = vpow2.f32 %v1009_v21 }
 0x136   :  { %1032 = vpow2.f32 %v1011_v22 }
 0x137   :  { %1034 = vpow2.f32 %v1010_v23 }
 0x13a   :  { %v1021_v24 = vpop.eup %1020 }
 0x13b   :  { %v660_v28 = vadd.f32 1.0, %v1021_v24 }
 0x13c   :  { %v1023_v25 = vpop.eup %1022 }
 0x13d   :  { %v1025_v26 = vpop.eup %1024  ;;  %v661_v30 = vadd.f32 1.0, %v1023_v25  ;;  %1036 = vrcp.f32 %v660_v28 }
 0x13e   :  { %v1027_v27 = vpop.eup %1026  ;;  %v663_v32 = vadd.f32 1.0, %v1025_v26 }
 0x13f   :  { %v662_v34 = vadd.f32 1.0, %v1027_v27  ;;  %1038 = vrcp.f32 %v661_v30 }
 0x140   :  { %v1029_v29 = vpop.eup %1028  ;;  %1040 = vrcp.f32 %v663_v32 }
 0x141   :  { %v664_v36 = vadd.f32 1.0, %v1029_v29  ;;  %1042 = vrcp.f32 %v662_v34 }
 0x142   :  { %v1031_v31 = vpop.eup %1030 }
 0x143   :  { %v1033_v33 = vpop.eup %1032  ;;  %v665_v37 = vadd.f32 1.0, %v1031_v31  ;;  %1044 = vrcp.f32 %v664_v36 }
 0x144   :  { %v1035_v35 = vpop.eup %1034  ;;  %v667_v38 = vadd.f32 1.0, %v1033_v33 }
 0x145   :  { %v666_v39 = vadd.f32 1.0, %v1035_v35  ;;  %1046 = vrcp.f32 %v665_v37 }
 0x146   :  { %1048 = vrcp.f32 %v667_v38 }
 0x147   :  { %1050 = vrcp.f32 %v666_v39 }
 0x14a   :  { %v1037_v40 = vpop.eup %1036 }
 0x14b   :  { %v684_v51 = vmul.f32 %v1037_v40, %v394_v12 }
 0x14c   :  { %v1039_v41 = vpop.eup %1038 }
 0x14d   :  { %v1041_v42 = vpop.eup %1040  ;;  %v685_v48 = vmul.f32 %v1039_v41, %v396_v14 }
 0x14e   :  { %v1043_v43 = vpop.eup %1042  ;;  %v687_v49 = vmul.f32 %v1041_v42, %v473_v15 }
 0x14f   :  { %v686_v52 = vmul.f32 %v1043_v43, %v471_v13 }
 0x150   :  { %v1045_v44 = vpop.eup %1044 }
 0x151   :  { %v688_v2 = vmul.f32 %v1045_v44, %v1205_v63 }
 0x152   :  { %v1047_v47 = vpop.eup %1046 }
 0x153   :  { %v1049_v50 = vpop.eup %1048  ;;  %v689_v62 = vmul.f32 %v1047_v47, %v402_v18 }
 0x154   :  { %v1051_v55 = vpop.eup %1050  ;;  %v691_v0 = vmul.f32 %v1049_v50, %v479_v19 }
 0x155   :  { %v690_v3 = vmul.f32 %v1051_v55, %v1207_v16 }
 0x16e   :  { %v548_v45 = vpop.f32.mrf.mxu0  ;;  %v625_v46 = vpop.f32.mrf.mxu1 }
 0x16f   :  { %v692_v58 = vmul.f32 %v684_v51, %v548_v45  ;;  %v694_v59 = vmul.f32 %v686_v52, %v625_v46 }
 0x170   :  { %v550_v53 = vpop.f32.mrf.mxu0  ;;  %v627_v54 = vpop.f32.mrf.mxu1 }
 0x171   :  { %v693_v56 = vmul.f32 %v685_v48, %v550_v53  ;;  %v695_v57 = vmul.f32 %v687_v49, %v627_v54 }
 0x172   :  { %v554_v60 = vpop.f32.mrf.mxu0  ;;  %v631_v61 = vpop.f32.mrf.mxu1 }
 0x173   :  { %892 = vmatprep.mubr.f32.mxu0 %v693_v56  ;;  %969 = vmatprep.mubr.f32.mxu1 %v695_v57  ;;  %v696_v9 = vmul.f32 %v688_v2, %v554_v60  ;;  %v698_v10 = vmul.f32 %v690_v3, %v631_v61 }
 0x174   :  { %v556_v4 = vpop.f32.mrf.mxu0  ;;  %v633_v5 = vpop.f32.mrf.mxu1  ;;  %893 = vmatmul.mubr.f32.vlgmr.msra.gmra.mxu0 %v692_v58  ;;  %970 = vmatmul.mubr.f32.vlgmr.msra.gmra.mxu1 %v694_v59 }
 0x175   :  { %v697_v6 = vmul.f32 %v689_v62, %v556_v4  ;;  %v699_v7 = vmul.f32 %v691_v0, %v633_v5 }
 0x177   :  { %898 = vmatprep.mubr.f32.mxu0 %v697_v6  ;;  %975 = vmatprep.mubr.f32.mxu1 %v699_v7 }
 0x178   :  { %899 = vmatmul.mubr.f32.gmra.mxu0 %v696_v9  ;;  %976 = vmatmul.mubr.f32.gmra.mxu1 %v698_v10 }
 0x234   :  { %v894_v12 = vpop.f32.mrf.mxu0  ;;  %v971_v13 = vpop.f32.mrf.mxu1 }
 0x235   :  { %v972_v14 = vadd.f32 %v971_v13, %v894_v12 }
 0x236   :  { %v896_v15 = vpop.f32.mrf.mxu0  ;;  %v973_v1 = vpop.f32.mrf.mxu1 }
 0x237   :  { %982 = vst [vmem:[#allocation8] sm:$0xff] %v972_v14  ;;  %v974_v63 = vadd.f32 %v973_v1, %v896_v15 }
 0x238   :  { %v900_v16 = vpop.f32.mrf.mxu0  ;;  %v977_v17 = vpop.f32.mrf.mxu1 }
 0x239   :  { %983 = vst [vmem:[#allocation8 + $0x8] sm:$0xff] %v974_v63  ;;  %v978_v8 = vadd.f32 %v977_v17, %v900_v16 }
 0x23a   :  { %v902_v18 = vpop.f32.mrf.mxu0  ;;  %v979_v11 = vpop.f32.mrf.mxu1 }
 0x23b   :  { %984 = vst [vmem:[#allocation8 + $0x10] sm:$0xff] %v978_v8  ;;  %v980_v19 = vadd.f32 %v979_v11, %v902_v18 }
 0x23d   :  { %985 = vst [vmem:[#allocation8 + $0x18] sm:$0xff] %v980_v19 }
 0x23e   :  { %1123 = shalt.err (!%p1120_p5)
}
 0x23f   :  { %997 = dma.vmem_to_hbm [thread:$0]  %s992_s2, 512, %s1222_s3, [#allocation4], %s1142_s22, %s1142_s22, %s1143_s23  }
 0x240   :  { %1136 = dma.done.wait [#allocation4], 512  }
 0x241   :  { %1137 = vsyncadd [#allocation4], 4294966784 }
 0x242   :  { %1001 = vsyncpa [#allocation3], 1 }
 0x243   :  { %1002 = vsyncpa [#allocation6], 1 }
 0x244   :  { %1003 = vsyncpa [#allocation4], 1 }

</bundles_post_ra>
